<compile_context>
chip_gen: v7x
topology: tpu7x:2x2x1
jax: 0.10.0
libtpu: 0.0.40
codegen_flags: <defaults>
</compile_context>

<pallas_src>
import jax
import jax.numpy as jnp
from jax import lax
from jax.experimental import pallas as pl
from jax.experimental.pallas import tpu as pltpu


def _round_up(x, m):
    return (x + m - 1) // m * m


def _decoder_recurrence_kernel(
    u_as_ref,     # (Bb, T, A)    U-projection of features (+ attention W bias)
    fproj_ref,    # (Bb, T, 4D)   features @ W_ctx   (loop-invariant)
    gemb_ref,     # (S, Bb, 4D)   embed @ W_emb + bih + bhh (loop-invariant)
    h0_ref,       # (Bb, D)
    c0_ref,       # (Bb, D)
    whf_ref,      # (D, 4D + A)   fused [Whh | Ww]
    awT_ref,      # (1, A)        attention A weight, lane-major
    packed_ref,   # (S, Bb, PACK) out: [h | alpha | zero-pad], PACK % 128 == 0
):
    u_as = u_as_ref[...]
    fproj = fproj_ref[...]
    whf = whf_ref[...]
    awT = awT_ref[...]

    Bb, T, A = u_as.shape
    D = h0_ref.shape[1]
    G = 4 * D
    S = gemb_ref.shape[0]
    PACK = packed_ref.shape[2]
    pad_w = PACK - D - T

    # Hoisted once (JAX does not CSE broadcast_in_dim inside the loop).
    pad = jnp.zeros((Bb, pad_w), jnp.float32) if pad_w > 0 else None

    def step(s, carry):
        h, c = carry

        # --- single fused h-dependent matmul: [gates_hh | w_as] ------------
        hp = jnp.dot(h, whf, preferred_element_type=jnp.float32)   # (Bb, 4D+A)
        gates_h = hp[:, :G]
        w_as = hp[:, G:]

        # --- attention ------------------------------------------------------
        combined = jnp.tanh(u_as + w_as[:, None, :])                # (Bb, T, A)
        # Attention A-bias omitted: constant over T, cancels under softmax.
        # NOTE: for production A (>=512) express this contraction as an MXU
        # dot over A instead of VPU mul + lane reduce (XLU pressure on v6e/v7x).
        score = jnp.sum(combined * awT, axis=-1)                    # (Bb, T)
        score = score - jnp.max(score, axis=1, keepdims=True)
        exp_s = jnp.exp(score)
        inv_den = pl.reciprocal(jnp.sum(exp_s, axis=1, keepdims=True),
                                approx=True)
        alpha = exp_s * inv_den                                     # (Bb, T)

        # context @ W_ctx collapsed to one alpha-weighted reduction of the
        # hoisted feature projection -> one MXU push, no explicit context
        # tensor and no lane-dim concat inside the loop.
        gates_ctx = jnp.einsum('bqt,btg->bqg', alpha[:, None, :], fproj,
                               preferred_element_type=jnp.float32)[:, 0, :]

        # --- LSTM cell -------------------------------------------------------
        gates = gemb_ref[s] + gates_h + gates_ctx                   # (Bb, 4D)
        # TODO(synk): at production D (multiple of 128) these gate slices are
        # tile-aligned; at D=32 they cost a few lane shuffles per step.
        i_g = jax.nn.sigmoid(gates[:, 0 * D:1 * D])
        f_g = jax.nn.sigmoid(gates[:, 1 * D:2 * D])
        g_g = jnp.tanh(gates[:, 2 * D:3 * D])
        o_g = jax.nn.sigmoid(gates[:, 3 * D:4 * D])
        c_new = f_g * c + i_g * g_g
        h_new = o_g * jnp.tanh(c_new)

        # One lane-dense (PACK is a multiple of 128) unmasked store per step.
        parts = [h_new, alpha] + ([pad] if pad is not None else [])
        packed_ref[s] = jnp.concatenate(parts, axis=1)
        return h_new, c_new

    # S is small and static -> full unroll gives the LLO scheduler
    # cross-iteration visibility (MXU push of step s+1 overlaps step s's tail).
    lax.fori_loop(0, S, step, (h0_ref[...], c0_ref[...]), unroll=True)


def decoder_forward_pallas(features, captions, params):
    B, T, E = features.shape
    L = captions.shape[1]
    S = L - 1
    emb_table = params["embedding"]
    M = emb_table.shape[1]
    D = params["Hw"].shape[1]
    A = params["Uw"].shape[1]
    G = 4 * D
    PACK = max(128, _round_up(D + T, 128))
    f32 = jnp.float32

    # ---------------- hoisted, non-recurrent work (plain XLA) ----------------
    embed_seq = jnp.transpose(emb_table[captions[:, :S]], (1, 0, 2))     # (S,B,M)

    # Attention U-projection with the attention W bias folded in.
    u_as = (jnp.einsum('bte,ea->bta', features, params["Uw"],
                       preferred_element_type=f32)
            + params["Ub"] + params["Wb"])                               # (B,T,A)

    # init_h / init_c: loop-invariant, computed outside the kernel.
    mean_f = jnp.mean(features, axis=1)                                  # (B,E)
    h0 = (mean_f @ params["Hw"] + params["Hb"]).astype(f32)              # (B,D)
    c0 = (mean_f @ params["Cw"] + params["Cb"]).astype(f32)              # (B,D)

    # Embedding part of the LSTM gates + both LSTM biases, hoisted to one
    # batched matmul over all S steps.
    W_emb = params["Wih"][:M]                                            # (M,4D)
    W_ctx = params["Wih"][M:]                                            # (E,4D)
    gemb = (jnp.einsum('sbm,mg->sbg', embed_seq, W_emb,
                       preferred_element_type=f32)
            + params["bih"] + params["bhh"])                             # (S,B,4D)

    # Context part of the gates: project features once; per step the kernel
    # only does the alpha-weighted reduction over T.
    fproj = jnp.einsum('bte,eg->btg', features, W_ctx,
                       preferred_element_type=f32)                       # (B,T,4D)

    # Fused per-step h matmul weights: [Whh | Ww] (hh gates lane-aligned at 0).
    whf = jnp.concatenate([params["Whh"], params["Ww"]], axis=1)         # (D,4D+A)
    awT = params["Aw"].T                                                 # (1,A)

    # TODO(synk): for production shapes cast whf/fproj/u_as (and h per step)
    # to bf16 MXU operands with f32 accumulation; kept f32 at these toy shapes.

    Bb = B                      # batch block (== B here; split for v7x / big B)
    nb = B // Bb
    grid = (nb,)

    packed = pl.pallas_call(
        _decoder_recurrence_kernel,
        out_shape=jax.ShapeDtypeStruct((S, B, PACK), f32),
        grid=grid,
        in_specs=[
            pl.BlockSpec((Bb, T, A), lambda i: (i, 0, 0)),      # u_as
            pl.BlockSpec((Bb, T, G), lambda i: (i, 0, 0)),      # fproj
            pl.BlockSpec((S, Bb, G), lambda i: (0, i, 0)),      # gemb
            pl.BlockSpec((Bb, D), lambda i: (i, 0)),            # h0
            pl.BlockSpec((Bb, D), lambda i: (i, 0)),            # c0
            pl.BlockSpec((D, G + A), lambda i: (0, 0)),         # whf
            pl.BlockSpec((1, A), lambda i: (0, 0)),             # awT
        ],
        out_specs=pl.BlockSpec((S, Bb, PACK), lambda i: (0, i, 0)),
        compiler_params=pltpu.CompilerParams(
            dimension_semantics=("parallel",),
            vmem_limit_bytes=64 * 1024 * 1024),
    )(u_as, fproj, gemb, h0, c0, whf, awT)

    h_seq = packed[:, :, :D]                                             # (S,B,D)
    alphas_t = packed[:, :, D:D + T]                                     # (S,B,T)

    # Output head is not part of the recurrence: one big (S*B,D)x(D,V) matmul.
    preds_t = jnp.einsum('sbd,dv->sbv', h_seq, params["Fw"],
                         preferred_element_type=f32) + params["Fb"]
    # TODO(synk): nn.Dropout(p=0.3) applied as identity (eval-mode semantics).
    preds = jnp.transpose(preds_t, (1, 0, 2))                            # (B,S,V)
    alphas = jnp.transpose(alphas_t, (1, 0, 2))                          # (B,S,T)
    return preds, alphas


def decoder_forward_ref(features, captions, params):
    """Pure-JAX reference reproducing the PyTorch forward (eval mode)."""
    B, T, E = features.shape
    S = captions.shape[1] - 1
    D = params["Hw"].shape[1]
    emb_table = params["embedding"]

    embed = emb_table[captions]                           # (B, L, M)
    mean_f = jnp.mean(features, axis=1)
    h = mean_f @ params["Hw"] + params["Hb"]
    c = mean_f @ params["Cw"] + params["Cb"]

    preds, alphas = [], []
    for s in range(S):
        u_as = features @ params["Uw"] + params["Ub"]              # (B, T, A)
        w_as = h @ params["Ww"] + params["Wb"]                     # (B, A)
        combined = jnp.tanh(u_as + w_as[:, None, :])               # (B, T, A)
        score = jnp.squeeze(combined @ params["Aw"], -1) + params["Ab"][0, 0]
        alpha = jax.nn.softmax(score, axis=1)
        context = jnp.sum(features * alpha[:, :, None], axis=1)    # (B, E)

        lstm_inp = jnp.concatenate([embed[:, s], context], axis=1)
        gates = (lstm_inp @ params["Wih"] + params["bih"]
                 + h @ params["Whh"] + params["bhh"])
        i_g = jax.nn.sigmoid(gates[:, 0 * D:1 * D])
        f_g = jax.nn.sigmoid(gates[:, 1 * D:2 * D])
        g_g = jnp.tanh(gates[:, 2 * D:3 * D])
        o_g = jax.nn.sigmoid(gates[:, 3 * D:4 * D])
        c = f_g * c + i_g * g_g
        h = o_g * jnp.tanh(c)

        preds.append(h @ params["Fw"] + params["Fb"])
        alphas.append(alpha)
    return jnp.stack(preds, axis=1), jnp.stack(alphas, axis=1)


def init_params(key, *, embed_size, vocab_size, attention_dim,
                encoder_dim, decoder_dim):
    """Deterministic synthetic parameters. Linear weights stored as (in, out)."""
    ks = iter(jax.random.split(key, 24))

    def lin(in_d, out_d, scale=0.1):
        w = jax.random.normal(next(ks), (in_d, out_d), jnp.float32) * scale
        b = jax.random.normal(next(ks), (1, out_d), jnp.float32) * scale
        return w, b

    params = {}
    params["embedding"] = (jax.random.normal(next(ks), (vocab_size, embed_size),
                                             jnp.float32) * 0.1)
    params["Uw"], params["Ub"] = lin(encoder_dim, attention_dim)      # Attention.U
    params["Ww"], params["Wb"] = lin(decoder_dim, attention_dim)      # Attention.W
    params["Aw"], params["Ab"] = lin(attention_dim, 1)                # Attention.A
    params["Hw"], params["Hb"] = lin(encoder_dim, decoder_dim)        # init_h
    params["Cw"], params["Cb"] = lin(encoder_dim, decoder_dim)        # init_c
    params["Wih"], params["bih"] = lin(embed_size + encoder_dim,
                                       4 * decoder_dim)               # LSTMCell ih
    params["Whh"], params["bhh"] = lin(decoder_dim, 4 * decoder_dim)  # LSTMCell hh
    params["Fw"], params["Fb"] = lin(decoder_dim, vocab_size)         # fcn1
    # fcn2 is unused in Decoder.forward -> intentionally not materialized.
    return params


if __name__ == "__main__":
    B = 2            # batch
    T = 8            # num_timesteps (encoder spatial positions)
    encoder_dim = 32
    decoder_dim = 32
    attention_dim = 32
    embed_size = 32
    vocab_size = 64
    L = 9            # caption length -> seq_length = 8

    key = jax.random.PRNGKey(0)
    k_feat, k_cap, k_par = jax.random.split(key, 3)

    features = jax.random.normal(k_feat, (B, T, encoder_dim), jnp.float32)
    captions = jax.random.randint(k_cap, (B, L), 0, vocab_size, dtype=jnp.int32)
    params = init_params(k_par, embed_size=embed_size, vocab_size=vocab_size,
                         attention_dim=attention_dim, encoder_dim=encoder_dim,
                         decoder_dim=decoder_dim)

    preds, alphas = jax.jit(decoder_forward_pallas)(features, captions, params)
    preds = jax.block_until_ready(preds)
    alphas = jax.block_until_ready(alphas)

    preds_ref, alphas_ref = decoder_forward_ref(features, captions, params)

    assert preds.shape == (B, L - 1, vocab_size)
    assert alphas.shape == (B, L - 1, T)
    assert jnp.allclose(preds, preds_ref, atol=5e-3, rtol=5e-3)
    assert jnp.allclose(alphas, alphas_ref, atol=5e-3, rtol=5e-3)

    print("KERNEL_OK")
</pallas_src>

<mosaic_0001>
module attributes {stable_mosaic.version = 11 : i64} {
  func.func @_decoder_recurrence_kernel(%arg0: i32, %arg1: memref<2x8x32xf32, #tpu.memory_space<vmem>>, %arg2: memref<2x8x128xf32, #tpu.memory_space<vmem>>, %arg3: memref<8x2x128xf32, #tpu.memory_space<vmem>>, %arg4: memref<2x32xf32, #tpu.memory_space<vmem>>, %arg5: memref<2x32xf32, #tpu.memory_space<vmem>>, %arg6: memref<32x160xf32, #tpu.memory_space<vmem>>, %arg7: memref<1x32xf32, #tpu.memory_space<vmem>>, %arg8: memref<8x2x128xf32, #tpu.memory_space<vmem>>) attributes {dimension_semantics = [#tpu.dimension_semantics<parallel>], iteration_bounds = array<i64: 1>, scalar_prefetch = 0 : i64, scratch_operands = 0 : i64, tpu.core_type = #tpu.core_type<tc>, window_params = [{transform_indices = @transform_0, window_bounds = array<i64: 2, 8, 32>}, {transform_indices = @transform_1, window_bounds = array<i64: 2, 8, 128>}, {transform_indices = @transform_2, window_bounds = array<i64: 8, 2, 128>}, {transform_indices = @transform_3, window_bounds = array<i64: 2, 32>}, {transform_indices = @transform_4, window_bounds = array<i64: 2, 32>}, {pipeline_mode = #tpu.pipeline_mode<synchronous>, transform_indices = @transform_5, window_bounds = array<i64: 32, 160>}, {pipeline_mode = #tpu.pipeline_mode<synchronous>, transform_indices = @transform_6, window_bounds = array<i64: 1, 32>}, {transform_indices = @transform_7, window_bounds = array<i64: 8, 2, 128>}]} {
    %c0 = arith.constant 0 : index
    %c0_0 = arith.constant 0 : index
    %c0_1 = arith.constant 0 : index
    %0 = vector.load %arg1[%c0, %c0_0, %c0_1] : memref<2x8x32xf32, #tpu.memory_space<vmem>>, vector<2x8x32xf32>
    %c0_2 = arith.constant 0 : index
    %c0_3 = arith.constant 0 : index
    %c0_4 = arith.constant 0 : index
    %1 = vector.load %arg2[%c0_2, %c0_3, %c0_4] : memref<2x8x128xf32, #tpu.memory_space<vmem>>, vector<2x8x128xf32>
    %c0_5 = arith.constant 0 : index
    %c0_6 = arith.constant 0 : index
    %2 = vector.load %arg6[%c0_5, %c0_6] : memref<32x160xf32, #tpu.memory_space<vmem>>, vector<32x160xf32>
    %c0_7 = arith.constant 0 : index
    %c0_8 = arith.constant 0 : index
    %3 = vector.load %arg7[%c0_7, %c0_8] : memref<1x32xf32, #tpu.memory_space<vmem>>, vector<1x32xf32>
    %cst = arith.constant 0.000000e+00 : f32
    %4 = vector.broadcast %cst : f32 to vector<2x88xf32>
    %c0_9 = arith.constant 0 : index
    %c0_10 = arith.constant 0 : index
    %5 = vector.load %arg4[%c0_9, %c0_10] : memref<2x32xf32, #tpu.memory_space<vmem>>, vector<2x32xf32>
    %c0_11 = arith.constant 0 : index
    %c0_12 = arith.constant 0 : index
    %6 = vector.load %arg5[%c0_11, %c0_12] : memref<2x32xf32, #tpu.memory_space<vmem>>, vector<2x32xf32>
    %c0_i32 = arith.constant 0 : i32
    %cst_13 = arith.constant dense<0.000000e+00> : vector<2x160xf32>
    %7 = tpu.matmul %5, %2, %cst_13 {dimension_numbers = #tpu.dot_dimension_numbers<[1], [0], [0], [1], [0, 0, 1, 1], [], []>} : vector<2x32xf32>, vector<32x160xf32>, vector<2x160xf32> -> vector<2x160xf32>
    %8 = vector.extract_strided_slice %7 {offsets = [0, 0], sizes = [2, 128], strides = [1, 1]} : vector<2x160xf32> to vector<2x128xf32>
    %9 = vector.extract_strided_slice %7 {offsets = [0, 128], sizes = [2, 32], strides = [1, 1]} : vector<2x160xf32> to vector<2x32xf32>
    %10 = vector.shape_cast %9 : vector<2x32xf32> to vector<2x1x32xf32>
    %11 = vector.broadcast %10 : vector<2x1x32xf32> to vector<2x8x32xf32>
    %12 = arith.addf %0, %11 : vector<2x8x32xf32>
    %13 = math.tanh %12 : vector<2x8x32xf32>
    %14 = vector.shape_cast %3 : vector<1x32xf32> to vector<1x1x32xf32>
    %15 = vector.broadcast %14 : vector<1x1x32xf32> to vector<2x8x32xf32>
    %16 = arith.mulf %13, %15 : vector<2x8x32xf32>
    %cst_14 = arith.constant dense<0.000000e+00> : vector<2x8xf32>
    %17 = vector.multi_reduction <add>, %16, %cst_14 [2] : vector<2x8x32xf32> to vector<2x8xf32>
    %cst_15 = arith.constant dense<0xFF800000> : vector<2xf32>
    %18 = vector.multi_reduction <maximumf>, %17, %cst_15 [1] : vector<2x8xf32> to vector<2xf32>
    %19 = vector.shape_cast %18 : vector<2xf32> to vector<2x1xf32>
    %20 = vector.broadcast %19 : vector<2x1xf32> to vector<2x8xf32>
    %21 = arith.subf %17, %20 : vector<2x8xf32>
    %22 = math.exp %21 : vector<2x8xf32>
    %cst_16 = arith.constant dense<0.000000e+00> : vector<2xf32>
    %23 = vector.multi_reduction <add>, %22, %cst_16 [1] : vector<2x8xf32> to vector<2xf32>
    %24 = vector.shape_cast %23 : vector<2xf32> to vector<2x1xf32>
    %25 = tpu.reciprocal %24 {approx = true} : vector<2x1xf32> -> vector<2x1xf32>
    %26 = vector.broadcast %25 : vector<2x1xf32> to vector<2x8xf32>
    %27 = arith.mulf %22, %26 : vector<2x8xf32>
    %28 = vector.shape_cast %27 : vector<2x8xf32> to vector<2x1x8xf32>
    "tpu.trace_start"() <{level = 10 : i32, message = "bqt,btg->bqg"}> : () -> ()
    %cst_17 = arith.constant dense<0.000000e+00> : vector<2x1x128xf32>
    %29 = tpu.matmul %28, %1, %cst_17 {dimension_numbers = #tpu.dot_dimension_numbers<[2], [1], [1], [2], [0, 0, 0, 1, 1, 2], [0], [0]>} : vector<2x1x8xf32>, vector<2x8x128xf32>, vector<2x1x128xf32> -> vector<2x1x128xf32>
    "tpu.trace_stop"() : () -> ()
    %30 = vector.shape_cast %29 : vector<2x1x128xf32> to vector<2x128xf32>
    %31 = arith.index_cast %c0_i32 : i32 to index
    %c0_18 = arith.constant 0 : index
    %c0_19 = arith.constant 0 : index
    %32 = vector.load %arg3[%31, %c0_18, %c0_19] : memref<8x2x128xf32, #tpu.memory_space<vmem>>, vector<1x2x128xf32>
    %33 = vector.shape_cast %32 : vector<1x2x128xf32> to vector<2x128xf32>
    %34 = arith.addf %33, %8 : vector<2x128xf32>
    %35 = arith.addf %34, %30 : vector<2x128xf32>
    %36 = vector.extract_strided_slice %35 {offsets = [0, 0], sizes = [2, 32], strides = [1, 1]} : vector<2x128xf32> to vector<2x32xf32>
    %37 = arith.negf %36 : vector<2x32xf32>
    %38 = math.exp %37 : vector<2x32xf32>
    %cst_20 = arith.constant 1.000000e+00 : f32
    %39 = vector.broadcast %cst_20 : f32 to vector<2x32xf32>
    %40 = arith.addf %39, %38 : vector<2x32xf32>
    %41 = arith.divf %39, %40 : vector<2x32xf32>
    %42 = vector.extract_strided_slice %35 {offsets = [0, 32], sizes = [2, 32], strides = [1, 1]} : vector<2x128xf32> to vector<2x32xf32>
    %43 = arith.negf %42 : vector<2x32xf32>
    %44 = math.exp %43 : vector<2x32xf32>
    %cst_21 = arith.constant 1.000000e+00 : f32
    %45 = vector.broadcast %cst_21 : f32 to vector<2x32xf32>
    %46 = arith.addf %45, %44 : vector<2x32xf32>
    %47 = arith.divf %45, %46 : vector<2x32xf32>
    %48 = vector.extract_strided_slice %35 {offsets = [0, 64], sizes = [2, 32], strides = [1, 1]} : vector<2x128xf32> to vector<2x32xf32>
    %49 = math.tanh %48 : vector<2x32xf32>
    %50 = vector.extract_strided_slice %35 {offsets = [0, 96], sizes = [2, 32], strides = [1, 1]} : vector<2x128xf32> to vector<2x32xf32>
    %51 = arith.negf %50 : vector<2x32xf32>
    %52 = math.exp %51 : vector<2x32xf32>
    %cst_22 = arith.constant 1.000000e+00 : f32
    %53 = vector.broadcast %cst_22 : f32 to vector<2x32xf32>
    %54 = arith.addf %53, %52 : vector<2x32xf32>
    %55 = arith.divf %53, %54 : vector<2x32xf32>
    %56 = arith.mulf %47, %6 : vector<2x32xf32>
    %57 = arith.mulf %41, %49 : vector<2x32xf32>
    %58 = arith.addf %56, %57 : vector<2x32xf32>
    %59 = math.tanh %58 : vector<2x32xf32>
    %60 = arith.mulf %55, %59 : vector<2x32xf32>
    %61 = tpu.concatenate %60, %27, %4 in 1 : vector<2x32xf32>, vector<2x8xf32>, vector<2x88xf32> -> vector<2x128xf32>
    %62 = arith.index_cast %c0_i32 : i32 to index
    %c0_23 = arith.constant 0 : index
    %c0_24 = arith.constant 0 : index
    %63 = vector.load %arg8[%62, %c0_23, %c0_24] : memref<8x2x128xf32, #tpu.memory_space<vmem>>, vector<1x2x128xf32>
    %64 = vector.shape_cast %63 : vector<1x2x128xf32> to vector<2x128xf32>
    %65 = vector.shape_cast %61 : vector<2x128xf32> to vector<1x2x128xf32>
    tpu.vector_store %arg8[%62, %c0_23, %c0_24], %65 {strides = array<i32>} : memref<8x2x128xf32, #tpu.memory_space<vmem>>, vector<1x2x128xf32>,
    %c1_i32 = arith.constant 1 : i32
    %cst_25 = arith.constant dense<0.000000e+00> : vector<2x160xf32>
    %66 = tpu.matmul %60, %2, %cst_25 {dimension_numbers = #tpu.dot_dimension_numbers<[1], [0], [0], [1], [0, 0, 1, 1], [], []>} : vector<2x32xf32>, vector<32x160xf32>, vector<2x160xf32> -> vector<2x160xf32>
    %67 = vector.extract_strided_slice %66 {offsets = [0, 0], sizes = [2, 128], strides = [1, 1]} : vector<2x160xf32> to vector<2x128xf32>
    %68 = vector.extract_strided_slice %66 {offsets = [0, 128], sizes = [2, 32], strides = [1, 1]} : vector<2x160xf32> to vector<2x32xf32>
    %69 = vector.shape_cast %68 : vector<2x32xf32> to vector<2x1x32xf32>
    %70 = vector.broadcast %69 : vector<2x1x32xf32> to vector<2x8x32xf32>
    %71 = arith.addf %0, %70 : vector<2x8x32xf32>
    %72 = math.tanh %71 : vector<2x8x32xf32>
    %73 = vector.shape_cast %3 : vector<1x32xf32> to vector<1x1x32xf32>
    %74 = vector.broadcast %73 : vector<1x1x32xf32> to vector<2x8x32xf32>
    %75 = arith.mulf %72, %74 : vector<2x8x32xf32>
    %cst_26 = arith.constant dense<0.000000e+00> : vector<2x8xf32>
    %76 = vector.multi_reduction <add>, %75, %cst_26 [2] : vector<2x8x32xf32> to vector<2x8xf32>
    %cst_27 = arith.constant dense<0xFF800000> : vector<2xf32>
    %77 = vector.multi_reduction <maximumf>, %76, %cst_27 [1] : vector<2x8xf32> to vector<2xf32>
    %78 = vector.shape_cast %77 : vector<2xf32> to vector<2x1xf32>
    %79 = vector.broadcast %78 : vector<2x1xf32> to vector<2x8xf32>
    %80 = arith.subf %76, %79 : vector<2x8xf32>
    %81 = math.exp %80 : vector<2x8xf32>
    %cst_28 = arith.constant dense<0.000000e+00> : vector<2xf32>
    %82 = vector.multi_reduction <add>, %81, %cst_28 [1] : vector<2x8xf32> to vector<2xf32>
    %83 = vector.shape_cast %82 : vector<2xf32> to vector<2x1xf32>
    %84 = tpu.reciprocal %83 {approx = true} : vector<2x1xf32> -> vector<2x1xf32>
    %85 = vector.broadcast %84 : vector<2x1xf32> to vector<2x8xf32>
    %86 = arith.mulf %81, %85 : vector<2x8xf32>
    %87 = vector.shape_cast %86 : vector<2x8xf32> to vector<2x1x8xf32>
    "tpu.trace_start"() <{level = 10 : i32, message = "bqt,btg->bqg"}> : () -> ()
    %cst_29 = arith.constant dense<0.000000e+00> : vector<2x1x128xf32>
    %88 = tpu.matmul %87, %1, %cst_29 {dimension_numbers = #tpu.dot_dimension_numbers<[2], [1], [1], [2], [0, 0, 0, 1, 1, 2], [0], [0]>} : vector<2x1x8xf32>, vector<2x8x128xf32>, vector<2x1x128xf32> -> vector<2x1x128xf32>
    "tpu.trace_stop"() : () -> ()
    %89 = vector.shape_cast %88 : vector<2x1x128xf32> to vector<2x128xf32>
    %90 = arith.index_cast %c1_i32 : i32 to index
    %c0_30 = arith.constant 0 : index
    %c0_31 = arith.constant 0 : index
    %91 = vector.load %arg3[%90, %c0_30, %c0_31] : memref<8x2x128xf32, #tpu.memory_space<vmem>>, vector<1x2x128xf32>
    %92 = vector.shape_cast %91 : vector<1x2x128xf32> to vector<2x128xf32>
    %93 = arith.addf %92, %67 : vector<2x128xf32>
    %94 = arith.addf %93, %89 : vector<2x128xf32>
    %95 = vector.extract_strided_slice %94 {offsets = [0, 0], sizes = [2, 32], strides = [1, 1]} : vector<2x128xf32> to vector<2x32xf32>
    %96 = arith.negf %95 : vector<2x32xf32>
    %97 = math.exp %96 : vector<2x32xf32>
    %cst_32 = arith.constant 1.000000e+00 : f32
    %98 = vector.broadcast %cst_32 : f32 to vector<2x32xf32>
    %99 = arith.addf %98, %97 : vector<2x32xf32>
    %100 = arith.divf %98, %99 : vector<2x32xf32>
    %101 = vector.extract_strided_slice %94 {offsets = [0, 32], sizes = [2, 32], strides = [1, 1]} : vector<2x128xf32> to vector<2x32xf32>
    %102 = arith.negf %101 : vector<2x32xf32>
    %103 = math.exp %102 : vector<2x32xf32>
    %cst_33 = arith.constant 1.000000e+00 : f32
    %104 = vector.broadcast %cst_33 : f32 to vector<2x32xf32>
    %105 = arith.addf %104, %103 : vector<2x32xf32>
    %106 = arith.divf %104, %105 : vector<2x32xf32>
    %107 = vector.extract_strided_slice %94 {offsets = [0, 64], sizes = [2, 32], strides = [1, 1]} : vector<2x128xf32> to vector<2x32xf32>
    %108 = math.tanh %107 : vector<2x32xf32>
    %109 = vector.extract_strided_slice %94 {offsets = [0, 96], sizes = [2, 32], strides = [1, 1]} : vector<2x128xf32> to vector<2x32xf32>
    %110 = arith.negf %109 : vector<2x32xf32>
    %111 = math.exp %110 : vector<2x32xf32>
    %cst_34 = arith.constant 1.000000e+00 : f32
    %112 = vector.broadcast %cst_34 : f32 to vector<2x32xf32>
    %113 = arith.addf %112, %111 : vector<2x32xf32>
    %114 = arith.divf %112, %113 : vector<2x32xf32>
    %115 = arith.mulf %106, %58 : vector<2x32xf32>
    %116 = arith.mulf %100, %108 : vector<2x32xf32>
    %117 = arith.addf %115, %116 : vector<2x32xf32>
    %118 = math.tanh %117 : vector<2x32xf32>
    %119 = arith.mulf %114, %118 : vector<2x32xf32>
    %120 = tpu.concatenate %119, %86, %4 in 1 : vector<2x32xf32>, vector<2x8xf32>, vector<2x88xf32> -> vector<2x128xf32>
    %121 = arith.index_cast %c1_i32 : i32 to index
    %c0_35 = arith.constant 0 : index
    %c0_36 = arith.constant 0 : index
    %122 = vector.load %arg8[%121, %c0_35, %c0_36] : memref<8x2x128xf32, #tpu.memory_space<vmem>>, vector<1x2x128xf32>
    %123 = vector.shape_cast %122 : vector<1x2x128xf32> to vector<2x128xf32>
    %124 = vector.shape_cast %120 : vector<2x128xf32> to vector<1x2x128xf32>
    tpu.vector_store %arg8[%121, %c0_35, %c0_36], %124 {strides = array<i32>} : memref<8x2x128xf32, #tpu.memory_space<vmem>>, vector<1x2x128xf32>,
    %c2_i32 = arith.constant 2 : i32
    %cst_37 = arith.constant dense<0.000000e+00> : vector<2x160xf32>
    %125 = tpu.matmul %119, %2, %cst_37 {dimension_numbers = #tpu.dot_dimension_numbers<[1], [0], [0], [1], [0, 0, 1, 1], [], []>} : vector<2x32xf32>, vector<32x160xf32>, vector<2x160xf32> -> vector<2x160xf32>
    %126 = vector.extract_strided_slice %125 {offsets = [0, 0], sizes = [2, 128], strides = [1, 1]} : vector<2x160xf32> to vector<2x128xf32>
    %127 = vector.extract_strided_slice %125 {offsets = [0, 128], sizes = [2, 32], strides = [1, 1]} : vector<2x160xf32> to vector<2x32xf32>
    %128 = vector.shape_cast %127 : vector<2x32xf32> to vector<2x1x32xf32>
    %129 = vector.broadcast %128 : vector<2x1x32xf32> to vector<2x8x32xf32>
    %130 = arith.addf %0, %129 : vector<2x8x32xf32>
    %131 = math.tanh %130 : vector<2x8x32xf32>
    %132 = vector.shape_cast %3 : vector<1x32xf32> to vector<1x1x32xf32>
    %133 = vector.broadcast %132 : vector<1x1x32xf32> to vector<2x8x32xf32>
    %134 = arith.mulf %131, %133 : vector<2x8x32xf32>
    %cst_38 = arith.constant dense<0.000000e+00> : vector<2x8xf32>
    %135 = vector.multi_reduction <add>, %134, %cst_38 [2] : vector<2x8x32xf32> to vector<2x8xf32>
    %cst_39 = arith.constant dense<0xFF800000> : vector<2xf32>
    %136 = vector.multi_reduction <maximumf>, %135, %cst_39 [1] : vector<2x8xf32> to vector<2xf32>
    %137 = vector.shape_cast %136 : vector<2xf32> to vector<2x1xf32>
    %138 = vector.broadcast %137 : vector<2x1xf32> to vector<2x8xf32>
    %139 = arith.subf %135, %138 : vector<2x8xf32>
    %140 = math.exp %139 : vector<2x8xf32>
    %cst_40 = arith.constant dense<0.000000e+00> : vector<2xf32>
    %141 = vector.multi_reduction <add>, %140, %cst_40 [1] : vector<2x8xf32> to vector<2xf32>
    %142 = vector.shape_cast %141 : vector<2xf32> to vector<2x1xf32>
    %143 = tpu.reciprocal %142 {approx = true} : vector<2x1xf32> -> vector<2x1xf32>
    %144 = vector.broadcast %143 : vector<2x1xf32> to vector<2x8xf32>
    %145 = arith.mulf %140, %144 : vector<2x8xf32>
    %146 = vector.shape_cast %145 : vector<2x8xf32> to vector<2x1x8xf32>
    "tpu.trace_start"() <{level = 10 : i32, message = "bqt,btg->bqg"}> : () -> ()
    %cst_41 = arith.constant dense<0.000000e+00> : vector<2x1x128xf32>
    %147 = tpu.matmul %146, %1, %cst_41 {dimension_numbers = #tpu.dot_dimension_numbers<[2], [1], [1], [2], [0, 0, 0, 1, 1, 2], [0], [0]>} : vector<2x1x8xf32>, vector<2x8x128xf32>, vector<2x1x128xf32> -> vector<2x1x128xf32>
    "tpu.trace_stop"() : () -> ()
    %148 = vector.shape_cast %147 : vector<2x1x128xf32> to vector<2x128xf32>
    %149 = arith.index_cast %c2_i32 : i32 to index
    %c0_42 = arith.constant 0 : index
    %c0_43 = arith.constant 0 : index
    %150 = vector.load %arg3[%149, %c0_42, %c0_43] : memref<8x2x128xf32, #tpu.memory_space<vmem>>, vector<1x2x128xf32>
    %151 = vector.shape_cast %150 : vector<1x2x128xf32> to vector<2x128xf32>
    %152 = arith.addf %151, %126 : vector<2x128xf32>
    %153 = arith.addf %152, %148 : vector<2x128xf32>
    %154 = vector.extract_strided_slice %153 {offsets = [0, 0], sizes = [2, 32], strides = [1, 1]} : vector<2x128xf32> to vector<2x32xf32>
    %155 = arith.negf %154 : vector<2x32xf32>
    %156 = math.exp %155 : vector<2x32xf32>
    %cst_44 = arith.constant 1.000000e+00 : f32
    %157 = vector.broadcast %cst_44 : f32 to vector<2x32xf32>
    %158 = arith.addf %157, %156 : vector<2x32xf32>
    %159 = arith.divf %157, %158 : vector<2x32xf32>
    %160 = vector.extract_strided_slice %153 {offsets = [0, 32], sizes = [2, 32], strides = [1, 1]} : vector<2x128xf32> to vector<2x32xf32>
    %161 = arith.negf %160 : vector<2x32xf32>
    %162 = math.exp %161 : vector<2x32xf32>
    %cst_45 = arith.constant 1.000000e+00 : f32
    %163 = vector.broadcast %cst_45 : f32 to vector<2x32xf32>
    %164 = arith.addf %163, %162 : vector<2x32xf32>
    %165 = arith.divf %163, %164 : vector<2x32xf32>
    %166 = vector.extract_strided_slice %153 {offsets = [0, 64], sizes = [2, 32], strides = [1, 1]} : vector<2x128xf32> to vector<2x32xf32>
    %167 = math.tanh %166 : vector<2x32xf32>
    %168 = vector.extract_strided_slice %153 {offsets = [0, 96], sizes = [2, 32], strides = [1, 1]} : vector<2x128xf32> to vector<2x32xf32>
    %169 = arith.negf %168 : vector<2x32xf32>
    %170 = math.exp %169 : vector<2x32xf32>
    %cst_46 = arith.constant 1.000000e+00 : f32
    %171 = vector.broadcast %cst_46 : f32 to vector<2x32xf32>
    %172 = arith.addf %171, %170 : vector<2x32xf32>
    %173 = arith.divf %171, %172 : vector<2x32xf32>
    %174 = arith.mulf %165, %117 : vector<2x32xf32>
    %175 = arith.mulf %159, %167 : vector<2x32xf32>
    %176 = arith.addf %174, %175 : vector<2x32xf32>
    %177 = math.tanh %176 : vector<2x32xf32>
    %178 = arith.mulf %173, %177 : vector<2x32xf32>
    %179 = tpu.concatenate %178, %145, %4 in 1 : vector<2x32xf32>, vector<2x8xf32>, vector<2x88xf32> -> vector<2x128xf32>
    %180 = arith.index_cast %c2_i32 : i32 to index
    %c0_47 = arith.constant 0 : index
    %c0_48 = arith.constant 0 : index
    %181 = vector.load %arg8[%180, %c0_47, %c0_48] : memref<8x2x128xf32, #tpu.memory_space<vmem>>, vector<1x2x128xf32>
    %182 = vector.shape_cast %181 : vector<1x2x128xf32> to vector<2x128xf32>
    %183 = vector.shape_cast %179 : vector<2x128xf32> to vector<1x2x128xf32>
    tpu.vector_store %arg8[%180, %c0_47, %c0_48], %183 {strides = array<i32>} : memref<8x2x128xf32, #tpu.memory_space<vmem>>, vector<1x2x128xf32>,
    %c3_i32 = arith.constant 3 : i32
    %cst_49 = arith.constant dense<0.000000e+00> : vector<2x160xf32>
    %184 = tpu.matmul %178, %2, %cst_49 {dimension_numbers = #tpu.dot_dimension_numbers<[1], [0], [0], [1], [0, 0, 1, 1], [], []>} : vector<2x32xf32>, vector<32x160xf32>, vector<2x160xf32> -> vector<2x160xf32>
    %185 = vector.extract_strided_slice %184 {offsets = [0, 0], sizes = [2, 128], strides = [1, 1]} : vector<2x160xf32> to vector<2x128xf32>
    %186 = vector.extract_strided_slice %184 {offsets = [0, 128], sizes = [2, 32], strides = [1, 1]} : vector<2x160xf32> to vector<2x32xf32>
    %187 = vector.shape_cast %186 : vector<2x32xf32> to vector<2x1x32xf32>
    %188 = vector.broadcast %187 : vector<2x1x32xf32> to vector<2x8x32xf32>
    %189 = arith.addf %0, %188 : vector<2x8x32xf32>
    %190 = math.tanh %189 : vector<2x8x32xf32>
    %191 = vector.shape_cast %3 : vector<1x32xf32> to vector<1x1x32xf32>
    %192 = vector.broadcast %191 : vector<1x1x32xf32> to vector<2x8x32xf32>
    %193 = arith.mulf %190, %192 : vector<2x8x32xf32>
    %cst_50 = arith.constant dense<0.000000e+00> : vector<2x8xf32>
    %194 = vector.multi_reduction <add>, %193, %cst_50 [2] : vector<2x8x32xf32> to vector<2x8xf32>
    %cst_51 = arith.constant dense<0xFF800000> : vector<2xf32>
    %195 = vector.multi_reduction <maximumf>, %194, %cst_51 [1] : vector<2x8xf32> to vector<2xf32>
    %196 = vector.shape_cast %195 : vector<2xf32> to vector<2x1xf32>
    %197 = vector.broadcast %196 : vector<2x1xf32> to vector<2x8xf32>
    %198 = arith.subf %194, %197 : vector<2x8xf32>
    %199 = math.exp %198 : vector<2x8xf32>
    %cst_52 = arith.constant dense<0.000000e+00> : vector<2xf32>
    %200 = vector.multi_reduction <add>, %199, %cst_52 [1] : vector<2x8xf32> to vector<2xf32>
    %201 = vector.shape_cast %200 : vector<2xf32> to vector<2x1xf32>
    %202 = tpu.reciprocal %201 {approx = true} : vector<2x1xf32> -> vector<2x1xf32>
    %203 = vector.broadcast %202 : vector<2x1xf32> to vector<2x8xf32>
    %204 = arith.mulf %199, %203 : vector<2x8xf32>
    %205 = vector.shape_cast %204 : vector<2x8xf32> to vector<2x1x8xf32>
    "tpu.trace_start"() <{level = 10 : i32, message = "bqt,btg->bqg"}> : () -> ()
    %cst_53 = arith.constant dense<0.000000e+00> : vector<2x1x128xf32>
    %206 = tpu.matmul %205, %1, %cst_53 {dimension_numbers = #tpu.dot_dimension_numbers<[2], [1], [1], [2], [0, 0, 0, 1, 1, 2], [0], [0]>} : vector<2x1x8xf32>, vector<2x8x128xf32>, vector<2x1x128xf32> -> vector<2x1x128xf32>
    "tpu.trace_stop"() : () -> ()
    %207 = vector.shape_cast %206 : vector<2x1x128xf32> to vector<2x128xf32>
    %208 = arith.index_cast %c3_i32 : i32 to index
    %c0_54 = arith.constant 0 : index
    %c0_55 = arith.constant 0 : index
    %209 = vector.load %arg3[%208, %c0_54, %c0_55] : memref<8x2x128xf32, #tpu.memory_space<vmem>>, vector<1x2x128xf32>
    %210 = vector.shape_cast %209 : vector<1x2x128xf32> to vector<2x128xf32>
    %211 = arith.addf %210, %185 : vector<2x128xf32>
    %212 = arith.addf %211, %207 : vector<2x128xf32>
    %213 = vector.extract_strided_slice %212 {offsets = [0, 0], sizes = [2, 32], strides = [1, 1]} : vector<2x128xf32> to vector<2x32xf32>
    %214 = arith.negf %213 : vector<2x32xf32>
    %215 = math.exp %214 : vector<2x32xf32>
    %cst_56 = arith.constant 1.000000e+00 : f32
    %216 = vector.broadcast %cst_56 : f32 to vector<2x32xf32>
    %217 = arith.addf %216, %215 : vector<2x32xf32>
    %218 = arith.divf %216, %217 : vector<2x32xf32>
    %219 = vector.extract_strided_slice %212 {offsets = [0, 32], sizes = [2, 32], strides = [1, 1]} : vector<2x128xf32> to vector<2x32xf32>
    %220 = arith.negf %219 : vector<2x32xf32>
    %221 = math.exp %220 : vector<2x32xf32>
    %cst_57 = arith.constant 1.000000e+00 : f32
    %222 = vector.broadcast %cst_57 : f32 to vector<2x32xf32>
    %223 = arith.addf %222, %221 : vector<2x32xf32>
    %224 = arith.divf %222, %223 : vector<2x32xf32>
    %225 = vector.extract_strided_slice %212 {offsets = [0, 64], sizes = [2, 32], strides = [1, 1]} : vector<2x128xf32> to vector<2x32xf32>
    %226 = math.tanh %225 : vector<2x32xf32>
    %227 = vector.extract_strided_slice %212 {offsets = [0, 96], sizes = [2, 32], strides = [1, 1]} : vector<2x128xf32> to vector<2x32xf32>
    %228 = arith.negf %227 : vector<2x32xf32>
    %229 = math.exp %228 : vector<2x32xf32>
    %cst_58 = arith.constant 1.000000e+00 : f32
    %230 = vector.broadcast %cst_58 : f32 to vector<2x32xf32>
    %231 = arith.addf %230, %229 : vector<2x32xf32>
    %232 = arith.divf %230, %231 : vector<2x32xf32>
    %233 = arith.mulf %224, %176 : vector<2x32xf32>
    %234 = arith.mulf %218, %226 : vector<2x32xf32>
    %235 = arith.addf %233, %234 : vector<2x32xf32>
    %236 = math.tanh %235 : vector<2x32xf32>
    %237 = arith.mulf %232, %236 : vector<2x32xf32>
    %238 = tpu.concatenate %237, %204, %4 in 1 : vector<2x32xf32>, vector<2x8xf32>, vector<2x88xf32> -> vector<2x128xf32>
    %239 = arith.index_cast %c3_i32 : i32 to index
    %c0_59 = arith.constant 0 : index
    %c0_60 = arith.constant 0 : index
    %240 = vector.load %arg8[%239, %c0_59, %c0_60] : memref<8x2x128xf32, #tpu.memory_space<vmem>>, vector<1x2x128xf32>
    %241 = vector.shape_cast %240 : vector<1x2x128xf32> to vector<2x128xf32>
    %242 = vector.shape_cast %238 : vector<2x128xf32> to vector<1x2x128xf32>
    tpu.vector_store %arg8[%239, %c0_59, %c0_60], %242 {strides = array<i32>} : memref<8x2x128xf32, #tpu.memory_space<vmem>>, vector<1x2x128xf32>,
    %c4_i32 = arith.constant 4 : i32
    %cst_61 = arith.constant dense<0.000000e+00> : vector<2x160xf32>
    %243 = tpu.matmul %237, %2, %cst_61 {dimension_numbers = #tpu.dot_dimension_numbers<[1], [0], [0], [1], [0, 0, 1, 1], [], []>} : vector<2x32xf32>, vector<32x160xf32>, vector<2x160xf32> -> vector<2x160xf32>
    %244 = vector.extract_strided_slice %243 {offsets = [0, 0], sizes = [2, 128], strides = [1, 1]} : vector<2x160xf32> to vector<2x128xf32>
    %245 = vector.extract_strided_slice %243 {offsets = [0, 128], sizes = [2, 32], strides = [1, 1]} : vector<2x160xf32> to vector<2x32xf32>
    %246 = vector.shape_cast %245 : vector<2x32xf32> to vector<2x1x32xf32>
    %247 = vector.broadcast %246 : vector<2x1x32xf32> to vector<2x8x32xf32>
    %248 = arith.addf %0, %247 : vector<2x8x32xf32>
    %249 = math.tanh %248 : vector<2x8x32xf32>
    %250 = vector.shape_cast %3 : vector<1x32xf32> to vector<1x1x32xf32>
    %251 = vector.broadcast %250 : vector<1x1x32xf32> to vector<2x8x32xf32>
    %252 = arith.mulf %249, %251 : vector<2x8x32xf32>
    %cst_62 = arith.constant dense<0.000000e+00> : vector<2x8xf32>
    %253 = vector.multi_reduction <add>, %252, %cst_62 [2] : vector<2x8x32xf32> to vector<2x8xf32>
    %cst_63 = arith.constant dense<0xFF800000> : vector<2xf32>
    %254 = vector.multi_reduction <maximumf>, %253, %cst_63 [1] : vector<2x8xf32> to vector<2xf32>
    %255 = vector.shape_cast %254 : vector<2xf32> to vector<2x1xf32>
    %256 = vector.broadcast %255 : vector<2x1xf32> to vector<2x8xf32>
    %257 = arith.subf %253, %256 : vector<2x8xf32>
    %258 = math.exp %257 : vector<2x8xf32>
    %cst_64 = arith.constant dense<0.000000e+00> : vector<2xf32>
    %259 = vector.multi_reduction <add>, %258, %cst_64 [1] : vector<2x8xf32> to vector<2xf32>
    %260 = vector.shape_cast %259 : vector<2xf32> to vector<2x1xf32>
    %261 = tpu.reciprocal %260 {approx = true} : vector<2x1xf32> -> vector<2x1xf32>
    %262 = vector.broadcast %261 : vector<2x1xf32> to vector<2x8xf32>
    %263 = arith.mulf %258, %262 : vector<2x8xf32>
    %264 = vector.shape_cast %263 : vector<2x8xf32> to vector<2x1x8xf32>
    "tpu.trace_start"() <{level = 10 : i32, message = "bqt,btg->bqg"}> : () -> ()
    %cst_65 = arith.constant dense<0.000000e+00> : vector<2x1x128xf32>
    %265 = tpu.matmul %264, %1, %cst_65 {dimension_numbers = #tpu.dot_dimension_numbers<[2], [1], [1], [2], [0, 0, 0, 1, 1, 2], [0], [0]>} : vector<2x1x8xf32>, vector<2x8x128xf32>, vector<2x1x128xf32> -> vector<2x1x128xf32>
    "tpu.trace_stop"() : () -> ()
    %266 = vector.shape_cast %265 : vector<2x1x128xf32> to vector<2x128xf32>
    %267 = arith.index_cast %c4_i32 : i32 to index
    %c0_66 = arith.constant 0 : index
    %c0_67 = arith.constant 0 : index
    %268 = vector.load %arg3[%267, %c0_66, %c0_67] : memref<8x2x128xf32, #tpu.memory_space<vmem>>, vector<1x2x128xf32>
    %269 = vector.shape_cast %268 : vector<1x2x128xf32> to vector<2x128xf32>
    %270 = arith.addf %269, %244 : vector<2x128xf32>
    %271 = arith.addf %270, %266 : vector<2x128xf32>
    %272 = vector.extract_strided_slice %271 {offsets = [0, 0], sizes = [2, 32], strides = [1, 1]} : vector<2x128xf32> to vector<2x32xf32>
    %273 = arith.negf %272 : vector<2x32xf32>
    %274 = math.exp %273 : vector<2x32xf32>
    %cst_68 = arith.constant 1.000000e+00 : f32
    %275 = vector.broadcast %cst_68 : f32 to vector<2x32xf32>
    %276 = arith.addf %275, %274 : vector<2x32xf32>
    %277 = arith.divf %275, %276 : vector<2x32xf32>
    %278 = vector.extract_strided_slice %271 {offsets = [0, 32], sizes = [2, 32], strides = [1, 1]} : vector<2x128xf32> to vector<2x32xf32>
    %279 = arith.negf %278 : vector<2x32xf32>
    %280 = math.exp %279 : vector<2x32xf32>
    %cst_69 = arith.constant 1.000000e+00 : f32
    %281 = vector.broadcast %cst_69 : f32 to vector<2x32xf32>
    %282 = arith.addf %281, %280 : vector<2x32xf32>
    %283 = arith.divf %281, %282 : vector<2x32xf32>
    %284 = vector.extract_strided_slice %271 {offsets = [0, 64], sizes = [2, 32], strides = [1, 1]} : vector<2x128xf32> to vector<2x32xf32>
    %285 = math.tanh %284 : vector<2x32xf32>
    %286 = vector.extract_strided_slice %271 {offsets = [0, 96], sizes = [2, 32], strides = [1, 1]} : vector<2x128xf32> to vector<2x32xf32>
    %287 = arith.negf %286 : vector<2x32xf32>
    %288 = math.exp %287 : vector<2x32xf32>
    %cst_70 = arith.constant 1.000000e+00 : f32
    %289 = vector.broadcast %cst_70 : f32 to vector<2x32xf32>
    %290 = arith.addf %289, %288 : vector<2x32xf32>
    %291 = arith.divf %289, %290 : vector<2x32xf32>
    %292 = arith.mulf %283, %235 : vector<2x32xf32>
    %293 = arith.mulf %277, %285 : vector<2x32xf32>
    %294 = arith.addf %292, %293 : vector<2x32xf32>
    %295 = math.tanh %294 : vector<2x32xf32>
    %296 = arith.mulf %291, %295 : vector<2x32xf32>
    %297 = tpu.concatenate %296, %263, %4 in 1 : vector<2x32xf32>, vector<2x8xf32>, vector<2x88xf32> -> vector<2x128xf32>
    %298 = arith.index_cast %c4_i32 : i32 to index
    %c0_71 = arith.constant 0 : index
    %c0_72 = arith.constant 0 : index
    %299 = vector.load %arg8[%298, %c0_71, %c0_72] : memref<8x2x128xf32, #tpu.memory_space<vmem>>, vector<1x2x128xf32>
    %300 = vector.shape_cast %299 : vector<1x2x128xf32> to vector<2x128xf32>
    %301 = vector.shape_cast %297 : vector<2x128xf32> to vector<1x2x128xf32>
    tpu.vector_store %arg8[%298, %c0_71, %c0_72], %301 {strides = array<i32>} : memref<8x2x128xf32, #tpu.memory_space<vmem>>, vector<1x2x128xf32>,
    %c5_i32 = arith.constant 5 : i32
    %cst_73 = arith.constant dense<0.000000e+00> : vector<2x160xf32>
    %302 = tpu.matmul %296, %2, %cst_73 {dimension_numbers = #tpu.dot_dimension_numbers<[1], [0], [0], [1], [0, 0, 1, 1], [], []>} : vector<2x32xf32>, vector<32x160xf32>, vector<2x160xf32> -> vector<2x160xf32>
    %303 = vector.extract_strided_slice %302 {offsets = [0, 0], sizes = [2, 128], strides = [1, 1]} : vector<2x160xf32> to vector<2x128xf32>
    %304 = vector.extract_strided_slice %302 {offsets = [0, 128], sizes = [2, 32], strides = [1, 1]} : vector<2x160xf32> to vector<2x32xf32>
    %305 = vector.shape_cast %304 : vector<2x32xf32> to vector<2x1x32xf32>
    %306 = vector.broadcast %305 : vector<2x1x32xf32> to vector<2x8x32xf32>
    %307 = arith.addf %0, %306 : vector<2x8x32xf32>
    %308 = math.tanh %307 : vector<2x8x32xf32>
    %309 = vector.shape_cast %3 : vector<1x32xf32> to vector<1x1x32xf32>
    %310 = vector.broadcast %309 : vector<1x1x32xf32> to vector<2x8x32xf32>
    %311 = arith.mulf %308, %310 : vector<2x8x32xf32>
    %cst_74 = arith.constant dense<0.000000e+00> : vector<2x8xf32>
    %312 = vector.multi_reduction <add>, %311, %cst_74 [2] : vector<2x8x32xf32> to vector<2x8xf32>
    %cst_75 = arith.constant dense<0xFF800000> : vector<2xf32>
    %313 = vector.multi_reduction <maximumf>, %312, %cst_75 [1] : vector<2x8xf32> to vector<2xf32>
    %314 = vector.shape_cast %313 : vector<2xf32> to vector<2x1xf32>
    %315 = vector.broadcast %314 : vector<2x1xf32> to vector<2x8xf32>
    %316 = arith.subf %312, %315 : vector<2x8xf32>
    %317 = math.exp %316 : vector<2x8xf32>
    %cst_76 = arith.constant dense<0.000000e+00> : vector<2xf32>
    %318 = vector.multi_reduction <add>, %317, %cst_76 [1] : vector<2x8xf32> to vector<2xf32>
    %319 = vector.shape_cast %318 : vector<2xf32> to vector<2x1xf32>
    %320 = tpu.reciprocal %319 {approx = true} : vector<2x1xf32> -> vector<2x1xf32>
    %321 = vector.broadcast %320 : vector<2x1xf32> to vector<2x8xf32>
    %322 = arith.mulf %317, %321 : vector<2x8xf32>
    %323 = vector.shape_cast %322 : vector<2x8xf32> to vector<2x1x8xf32>
    "tpu.trace_start"() <{level = 10 : i32, message = "bqt,btg->bqg"}> : () -> ()
    %cst_77 = arith.constant dense<0.000000e+00> : vector<2x1x128xf32>
    %324 = tpu.matmul %323, %1, %cst_77 {dimension_numbers = #tpu.dot_dimension_numbers<[2], [1], [1], [2], [0, 0, 0, 1, 1, 2], [0], [0]>} : vector<2x1x8xf32>, vector<2x8x128xf32>, vector<2x1x128xf32> -> vector<2x1x128xf32>
    "tpu.trace_stop"() : () -> ()
    %325 = vector.shape_cast %324 : vector<2x1x128xf32> to vector<2x128xf32>
    %326 = arith.index_cast %c5_i32 : i32 to index
    %c0_78 = arith.constant 0 : index
    %c0_79 = arith.constant 0 : index
    %327 = vector.load %arg3[%326, %c0_78, %c0_79] : memref<8x2x128xf32, #tpu.memory_space<vmem>>, vector<1x2x128xf32>
    %328 = vector.shape_cast %327 : vector<1x2x128xf32> to vector<2x128xf32>
    %329 = arith.addf %328, %303 : vector<2x128xf32>
    %330 = arith.addf %329, %325 : vector<2x128xf32>
    %331 = vector.extract_strided_slice %330 {offsets = [0, 0], sizes = [2, 32], strides = [1, 1]} : vector<2x128xf32> to vector<2x32xf32>
    %332 = arith.negf %331 : vector<2x32xf32>
    %333 = math.exp %332 : vector<2x32xf32>
    %cst_80 = arith.constant 1.000000e+00 : f32
    %334 = vector.broadcast %cst_80 : f32 to vector<2x32xf32>
    %335 = arith.addf %334, %333 : vector<2x32xf32>
    %336 = arith.divf %334, %335 : vector<2x32xf32>
    %337 = vector.extract_strided_slice %330 {offsets = [0, 32], sizes = [2, 32], strides = [1, 1]} : vector<2x128xf32> to vector<2x32xf32>
    %338 = arith.negf %337 : vector<2x32xf32>
    %339 = math.exp %338 : vector<2x32xf32>
    %cst_81 = arith.constant 1.000000e+00 : f32
    %340 = vector.broadcast %cst_81 : f32 to vector<2x32xf32>
    %341 = arith.addf %340, %339 : vector<2x32xf32>
    %342 = arith.divf %340, %341 : vector<2x32xf32>
    %343 = vector.extract_strided_slice %330 {offsets = [0, 64], sizes = [2, 32], strides = [1, 1]} : vector<2x128xf32> to vector<2x32xf32>
    %344 = math.tanh %343 : vector<2x32xf32>
    %345 = vector.extract_strided_slice %330 {offsets = [0, 96], sizes = [2, 32], strides = [1, 1]} : vector<2x128xf32> to vector<2x32xf32>
    %346 = arith.negf %345 : vector<2x32xf32>
    %347 = math.exp %346 : vector<2x32xf32>
    %cst_82 = arith.constant 1.000000e+00 : f32
    %348 = vector.broadcast %cst_82 : f32 to vector<2x32xf32>
    %349 = arith.addf %348, %347 : vector<2x32xf32>
    %350 = arith.divf %348, %349 : vector<2x32xf32>
    %351 = arith.mulf %342, %294 : vector<2x32xf32>
    %352 = arith.mulf %336, %344 : vector<2x32xf32>
    %353 = arith.addf %351, %352 : vector<2x32xf32>
    %354 = math.tanh %353 : vector<2x32xf32>
    %355 = arith.mulf %350, %354 : vector<2x32xf32>
    %356 = tpu.concatenate %355, %322, %4 in 1 : vector<2x32xf32>, vector<2x8xf32>, vector<2x88xf32> -> vector<2x128xf32>
    %357 = arith.index_cast %c5_i32 : i32 to index
    %c0_83 = arith.constant 0 : index
    %c0_84 = arith.constant 0 : index
    %358 = vector.load %arg8[%357, %c0_83, %c0_84] : memref<8x2x128xf32, #tpu.memory_space<vmem>>, vector<1x2x128xf32>
    %359 = vector.shape_cast %358 : vector<1x2x128xf32> to vector<2x128xf32>
    %360 = vector.shape_cast %356 : vector<2x128xf32> to vector<1x2x128xf32>
    tpu.vector_store %arg8[%357, %c0_83, %c0_84], %360 {strides = array<i32>} : memref<8x2x128xf32, #tpu.memory_space<vmem>>, vector<1x2x128xf32>,
    %c6_i32 = arith.constant 6 : i32
    %cst_85 = arith.constant dense<0.000000e+00> : vector<2x160xf32>
    %361 = tpu.matmul %355, %2, %cst_85 {dimension_numbers = #tpu.dot_dimension_numbers<[1], [0], [0], [1], [0, 0, 1, 1], [], []>} : vector<2x32xf32>, vector<32x160xf32>, vector<2x160xf32> -> vector<2x160xf32>
    %362 = vector.extract_strided_slice %361 {offsets = [0, 0], sizes = [2, 128], strides = [1, 1]} : vector<2x160xf32> to vector<2x128xf32>
    %363 = vector.extract_strided_slice %361 {offsets = [0, 128], sizes = [2, 32], strides = [1, 1]} : vector<2x160xf32> to vector<2x32xf32>
    %364 = vector.shape_cast %363 : vector<2x32xf32> to vector<2x1x32xf32>
    %365 = vector.broadcast %364 : vector<2x1x32xf32> to vector<2x8x32xf32>
    %366 = arith.addf %0, %365 : vector<2x8x32xf32>
    %367 = math.tanh %366 : vector<2x8x32xf32>
    %368 = vector.shape_cast %3 : vector<1x32xf32> to vector<1x1x32xf32>
    %369 = vector.broadcast %368 : vector<1x1x32xf32> to vector<2x8x32xf32>
    %370 = arith.mulf %367, %369 : vector<2x8x32xf32>
    %cst_86 = arith.constant dense<0.000000e+00> : vector<2x8xf32>
    %371 = vector.multi_reduction <add>, %370, %cst_86 [2] : vector<2x8x32xf32> to vector<2x8xf32>
    %cst_87 = arith.constant dense<0xFF800000> : vector<2xf32>
    %372 = vector.multi_reduction <maximumf>, %371, %cst_87 [1] : vector<2x8xf32> to vector<2xf32>
    %373 = vector.shape_cast %372 : vector<2xf32> to vector<2x1xf32>
    %374 = vector.broadcast %373 : vector<2x1xf32> to vector<2x8xf32>
    %375 = arith.subf %371, %374 : vector<2x8xf32>
    %376 = math.exp %375 : vector<2x8xf32>
    %cst_88 = arith.constant dense<0.000000e+00> : vector<2xf32>
    %377 = vector.multi_reduction <add>, %376, %cst_88 [1] : vector<2x8xf32> to vector<2xf32>
    %378 = vector.shape_cast %377 : vector<2xf32> to vector<2x1xf32>
    %379 = tpu.reciprocal %378 {approx = true} : vector<2x1xf32> -> vector<2x1xf32>
    %380 = vector.broadcast %379 : vector<2x1xf32> to vector<2x8xf32>
    %381 = arith.mulf %376, %380 : vector<2x8xf32>
    %382 = vector.shape_cast %381 : vector<2x8xf32> to vector<2x1x8xf32>
    "tpu.trace_start"() <{level = 10 : i32, message = "bqt,btg->bqg"}> : () -> ()
    %cst_89 = arith.constant dense<0.000000e+00> : vector<2x1x128xf32>
    %383 = tpu.matmul %382, %1, %cst_89 {dimension_numbers = #tpu.dot_dimension_numbers<[2], [1], [1], [2], [0, 0, 0, 1, 1, 2], [0], [0]>} : vector<2x1x8xf32>, vector<2x8x128xf32>, vector<2x1x128xf32> -> vector<2x1x128xf32>
    "tpu.trace_stop"() : () -> ()
    %384 = vector.shape_cast %383 : vector<2x1x128xf32> to vector<2x128xf32>
    %385 = arith.index_cast %c6_i32 : i32 to index
    %c0_90 = arith.constant 0 : index
    %c0_91 = arith.constant 0 : index
    %386 = vector.load %arg3[%385, %c0_90, %c0_91] : memref<8x2x128xf32, #tpu.memory_space<vmem>>, vector<1x2x128xf32>
    %387 = vector.shape_cast %386 : vector<1x2x128xf32> to vector<2x128xf32>
    %388 = arith.addf %387, %362 : vector<2x128xf32>
    %389 = arith.addf %388, %384 : vector<2x128xf32>
    %390 = vector.extract_strided_slice %389 {offsets = [0, 0], sizes = [2, 32], strides = [1, 1]} : vector<2x128xf32> to vector<2x32xf32>
    %391 = arith.negf %390 : vector<2x32xf32>
    %392 = math.exp %391 : vector<2x32xf32>
    %cst_92 = arith.constant 1.000000e+00 : f32
    %393 = vector.broadcast %cst_92 : f32 to vector<2x32xf32>
    %394 = arith.addf %393, %392 : vector<2x32xf32>
    %395 = arith.divf %393, %394 : vector<2x32xf32>
    %396 = vector.extract_strided_slice %389 {offsets = [0, 32], sizes = [2, 32], strides = [1, 1]} : vector<2x128xf32> to vector<2x32xf32>
    %397 = arith.negf %396 : vector<2x32xf32>
    %398 = math.exp %397 : vector<2x32xf32>
    %cst_93 = arith.constant 1.000000e+00 : f32
    %399 = vector.broadcast %cst_93 : f32 to vector<2x32xf32>
    %400 = arith.addf %399, %398 : vector<2x32xf32>
    %401 = arith.divf %399, %400 : vector<2x32xf32>
    %402 = vector.extract_strided_slice %389 {offsets = [0, 64], sizes = [2, 32], strides = [1, 1]} : vector<2x128xf32> to vector<2x32xf32>
    %403 = math.tanh %402 : vector<2x32xf32>
    %404 = vector.extract_strided_slice %389 {offsets = [0, 96], sizes = [2, 32], strides = [1, 1]} : vector<2x128xf32> to vector<2x32xf32>
    %405 = arith.negf %404 : vector<2x32xf32>
    %406 = math.exp %405 : vector<2x32xf32>
    %cst_94 = arith.constant 1.000000e+00 : f32
    %407 = vector.broadcast %cst_94 : f32 to vector<2x32xf32>
    %408 = arith.addf %407, %406 : vector<2x32xf32>
    %409 = arith.divf %407, %408 : vector<2x32xf32>
    %410 = arith.mulf %401, %353 : vector<2x32xf32>
    %411 = arith.mulf %395, %403 : vector<2x32xf32>
    %412 = arith.addf %410, %411 : vector<2x32xf32>
    %413 = math.tanh %412 : vector<2x32xf32>
    %414 = arith.mulf %409, %413 : vector<2x32xf32>
    %415 = tpu.concatenate %414, %381, %4 in 1 : vector<2x32xf32>, vector<2x8xf32>, vector<2x88xf32> -> vector<2x128xf32>
    %416 = arith.index_cast %c6_i32 : i32 to index
    %c0_95 = arith.constant 0 : index
    %c0_96 = arith.constant 0 : index
    %417 = vector.load %arg8[%416, %c0_95, %c0_96] : memref<8x2x128xf32, #tpu.memory_space<vmem>>, vector<1x2x128xf32>
    %418 = vector.shape_cast %417 : vector<1x2x128xf32> to vector<2x128xf32>
    %419 = vector.shape_cast %415 : vector<2x128xf32> to vector<1x2x128xf32>
    tpu.vector_store %arg8[%416, %c0_95, %c0_96], %419 {strides = array<i32>} : memref<8x2x128xf32, #tpu.memory_space<vmem>>, vector<1x2x128xf32>,
    %c7_i32 = arith.constant 7 : i32
    %cst_97 = arith.constant dense<0.000000e+00> : vector<2x160xf32>
    %420 = tpu.matmul %414, %2, %cst_97 {dimension_numbers = #tpu.dot_dimension_numbers<[1], [0], [0], [1], [0, 0, 1, 1], [], []>} : vector<2x32xf32>, vector<32x160xf32>, vector<2x160xf32> -> vector<2x160xf32>
    %421 = vector.extract_strided_slice %420 {offsets = [0, 0], sizes = [2, 128], strides = [1, 1]} : vector<2x160xf32> to vector<2x128xf32>
    %422 = vector.extract_strided_slice %420 {offsets = [0, 128], sizes = [2, 32], strides = [1, 1]} : vector<2x160xf32> to vector<2x32xf32>
    %423 = vector.shape_cast %422 : vector<2x32xf32> to vector<2x1x32xf32>
    %424 = vector.broadcast %423 : vector<2x1x32xf32> to vector<2x8x32xf32>
    %425 = arith.addf %0, %424 : vector<2x8x32xf32>
    %426 = math.tanh %425 : vector<2x8x32xf32>
    %427 = vector.shape_cast %3 : vector<1x32xf32> to vector<1x1x32xf32>
    %428 = vector.broadcast %427 : vector<1x1x32xf32> to vector<2x8x32xf32>
    %429 = arith.mulf %426, %428 : vector<2x8x32xf32>
    %cst_98 = arith.constant dense<0.000000e+00> : vector<2x8xf32>
    %430 = vector.multi_reduction <add>, %429, %cst_98 [2] : vector<2x8x32xf32> to vector<2x8xf32>
    %cst_99 = arith.constant dense<0xFF800000> : vector<2xf32>
    %431 = vector.multi_reduction <maximumf>, %430, %cst_99 [1] : vector<2x8xf32> to vector<2xf32>
    %432 = vector.shape_cast %431 : vector<2xf32> to vector<2x1xf32>
    %433 = vector.broadcast %432 : vector<2x1xf32> to vector<2x8xf32>
    %434 = arith.subf %430, %433 : vector<2x8xf32>
    %435 = math.exp %434 : vector<2x8xf32>
    %cst_100 = arith.constant dense<0.000000e+00> : vector<2xf32>
    %436 = vector.multi_reduction <add>, %435, %cst_100 [1] : vector<2x8xf32> to vector<2xf32>
    %437 = vector.shape_cast %436 : vector<2xf32> to vector<2x1xf32>
    %438 = tpu.reciprocal %437 {approx = true} : vector<2x1xf32> -> vector<2x1xf32>
    %439 = vector.broadcast %438 : vector<2x1xf32> to vector<2x8xf32>
    %440 = arith.mulf %435, %439 : vector<2x8xf32>
    %441 = vector.shape_cast %440 : vector<2x8xf32> to vector<2x1x8xf32>
    "tpu.trace_start"() <{level = 10 : i32, message = "bqt,btg->bqg"}> : () -> ()
    %cst_101 = arith.constant dense<0.000000e+00> : vector<2x1x128xf32>
    %442 = tpu.matmul %441, %1, %cst_101 {dimension_numbers = #tpu.dot_dimension_numbers<[2], [1], [1], [2], [0, 0, 0, 1, 1, 2], [0], [0]>} : vector<2x1x8xf32>, vector<2x8x128xf32>, vector<2x1x128xf32> -> vector<2x1x128xf32>
    "tpu.trace_stop"() : () -> ()
    %443 = vector.shape_cast %442 : vector<2x1x128xf32> to vector<2x128xf32>
    %444 = arith.index_cast %c7_i32 : i32 to index
    %c0_102 = arith.constant 0 : index
    %c0_103 = arith.constant 0 : index
    %445 = vector.load %arg3[%444, %c0_102, %c0_103] : memref<8x2x128xf32, #tpu.memory_space<vmem>>, vector<1x2x128xf32>
    %446 = vector.shape_cast %445 : vector<1x2x128xf32> to vector<2x128xf32>
    %447 = arith.addf %446, %421 : vector<2x128xf32>
    %448 = arith.addf %447, %443 : vector<2x128xf32>
    %449 = vector.extract_strided_slice %448 {offsets = [0, 0], sizes = [2, 32], strides = [1, 1]} : vector<2x128xf32> to vector<2x32xf32>
    %450 = arith.negf %449 : vector<2x32xf32>
    %451 = math.exp %450 : vector<2x32xf32>
    %cst_104 = arith.constant 1.000000e+00 : f32
    %452 = vector.broadcast %cst_104 : f32 to vector<2x32xf32>
    %453 = arith.addf %452, %451 : vector<2x32xf32>
    %454 = arith.divf %452, %453 : vector<2x32xf32>
    %455 = vector.extract_strided_slice %448 {offsets = [0, 32], sizes = [2, 32], strides = [1, 1]} : vector<2x128xf32> to vector<2x32xf32>
    %456 = arith.negf %455 : vector<2x32xf32>
    %457 = math.exp %456 : vector<2x32xf32>
    %cst_105 = arith.constant 1.000000e+00 : f32
    %458 = vector.broadcast %cst_105 : f32 to vector<2x32xf32>
    %459 = arith.addf %458, %457 : vector<2x32xf32>
    %460 = arith.divf %458, %459 : vector<2x32xf32>
    %461 = vector.extract_strided_slice %448 {offsets = [0, 64], sizes = [2, 32], strides = [1, 1]} : vector<2x128xf32> to vector<2x32xf32>
    %462 = math.tanh %461 : vector<2x32xf32>
    %463 = vector.extract_strided_slice %448 {offsets = [0, 96], sizes = [2, 32], strides = [1, 1]} : vector<2x128xf32> to vector<2x32xf32>
    %464 = arith.negf %463 : vector<2x32xf32>
    %465 = math.exp %464 : vector<2x32xf32>
    %cst_106 = arith.constant 1.000000e+00 : f32
    %466 = vector.broadcast %cst_106 : f32 to vector<2x32xf32>
    %467 = arith.addf %466, %465 : vector<2x32xf32>
    %468 = arith.divf %466, %467 : vector<2x32xf32>
    %469 = arith.mulf %460, %412 : vector<2x32xf32>
    %470 = arith.mulf %454, %462 : vector<2x32xf32>
    %471 = arith.addf %469, %470 : vector<2x32xf32>
    %472 = math.tanh %471 : vector<2x32xf32>
    %473 = arith.mulf %468, %472 : vector<2x32xf32>
    %474 = tpu.concatenate %473, %440, %4 in 1 : vector<2x32xf32>, vector<2x8xf32>, vector<2x88xf32> -> vector<2x128xf32>
    %475 = arith.index_cast %c7_i32 : i32 to index
    %c0_107 = arith.constant 0 : index
    %c0_108 = arith.constant 0 : index
    %476 = vector.load %arg8[%475, %c0_107, %c0_108] : memref<8x2x128xf32, #tpu.memory_space<vmem>>, vector<1x2x128xf32>
    %477 = vector.shape_cast %476 : vector<1x2x128xf32> to vector<2x128xf32>
    %478 = vector.shape_cast %474 : vector<2x128xf32> to vector<1x2x128xf32>
    tpu.vector_store %arg8[%475, %c0_107, %c0_108], %478 {strides = array<i32>} : memref<8x2x128xf32, #tpu.memory_space<vmem>>, vector<1x2x128xf32>,
    %c8_i32 = arith.constant 8 : i32
    return
  }
  func.func @transform_0(%arg0: i32) -> (i32, i32, i32) {
    %c0_i32 = arith.constant 0 : i32
    %c0_i32_0 = arith.constant 0 : i32
    %c0_i32_1 = arith.constant 0 : i32
    return %arg0, %c0_i32, %c0_i32_0 : i32, i32, i32
  }
  func.func @transform_1(%arg0: i32) -> (i32, i32, i32) {
    %c0_i32 = arith.constant 0 : i32
    %c0_i32_0 = arith.constant 0 : i32
    %c0_i32_1 = arith.constant 0 : i32
    return %arg0, %c0_i32, %c0_i32_0 : i32, i32, i32
  }
  func.func @transform_2(%arg0: i32) -> (i32, i32, i32) {
    %c0_i32 = arith.constant 0 : i32
    %c0_i32_0 = arith.constant 0 : i32
    %c0_i32_1 = arith.constant 0 : i32
    return %c0_i32, %arg0, %c0_i32_0 : i32, i32, i32
  }
  func.func @transform_3(%arg0: i32) -> (i32, i32) {
    %c0_i32 = arith.constant 0 : i32
    %c0_i32_0 = arith.constant 0 : i32
    return %arg0, %c0_i32 : i32, i32
  }
  func.func @transform_4(%arg0: i32) -> (i32, i32) {
    %c0_i32 = arith.constant 0 : i32
    %c0_i32_0 = arith.constant 0 : i32
    return %arg0, %c0_i32 : i32, i32
  }
  func.func @transform_5(%arg0: i32) -> (i32, i32) {
    %c0_i32 = arith.constant 0 : i32
    %c0_i32_0 = arith.constant 0 : i32
    %c0_i32_1 = arith.constant 0 : i32
    return %c0_i32, %c0_i32_0 : i32, i32
  }
  func.func @transform_6(%arg0: i32) -> (i32, i32) {
    %c0_i32 = arith.constant 0 : i32
    %c0_i32_0 = arith.constant 0 : i32
    %c0_i32_1 = arith.constant 0 : i32
    return %c0_i32, %c0_i32_0 : i32, i32
  }
  func.func @transform_7(%arg0: i32) -> (i32, i32, i32) {
    %c0_i32 = arith.constant 0 : i32
    %c0_i32_0 = arith.constant 0 : i32
    %c0_i32_1 = arith.constant 0 : i32
    return %c0_i32, %arg0, %c0_i32_0 : i32, i32, i32
  }
}

</mosaic_0001>

<bundles_post_ra>
// kernel: decoder_forward_pallas.1
= control target key start
LH: loop header
LB: loop body
LE: loop exit
PB: predicated region body
PF: predicated region fallthrough
CT: control target
= control target key end

     0   :  { %12 = vsyncpa [#allocation3], 0  ;;  %s4578_s0 = inlined_call_operand.hbm [shape: f32[2,8,32], index: 0, kind: input, shape index: {}]   ;;  %s4579_s1 = inlined_call_operand.hbm [shape: f32[2,8,128], index: 1, kind: input, shape index: {}]   ;;  %s4580_s2 = inlined_call_operand.hbm [shape: f32[8,2,128], index: 2, kind: input, shape index: {}]   ;;  %s4581_s3 = inlined_call_operand.hbm [shape: f32[2,32], index: 3, kind: input, shape index: {}]   ;;  %s4582_s4 = inlined_call_operand.hbm [shape: f32[2,32], index: 4, kind: input, shape index: {}]   ;;  %s4583_s5 = inlined_call_operand.hbm [shape: f32[32,160], index: 5, kind: input, shape index: {}]   ;;  %s4584_s6 = inlined_call_operand.hbm [shape: f32[1,32], index: 6, kind: input, shape index: {}]   ;;  %s4585_s7 = inlined_call_operand.hbm [shape: f32[8,2,128], index: 7, kind: output, shape index: {}]  }
   0x1   :  { %13 = vsyncpa [#allocation6], 0 }
   0x2   :  { %14 = vsyncpa [#allocation9], 0 }
   0x3   :  { %15 = vsyncpa [#allocation12], 0 }
   0x4   :  { %16 = vsyncpa [#allocation4], 0  ;;  %s3901_s24 = smov [#allocation5]   ;;  %s3902_s26 = smov [#allocation8]  }
   0x5   :  { %s34_s25 = sshll.u32 %s3901_s24, 4  ;;  %s59_s27 = sshll.u32 %s3902_s26, 4  ;;  %s35_s25 = int_to_ptr.vmem [resolvable:$true] %s34_s25  ;;  %s60_s27 = int_to_ptr.vmem [resolvable:$true] %s59_s27 }
   0x6   :  { %s3715_s30 = scalar_lea.hbm %s4579_s1, 256 }
   0x7   :  { %p3716_p0 = scmp.ne.s32.totalorder %s4579_s1, %s3715_s30  ;;  %p3719_p1 = scmp.lt.u32.totalorder %s3715_s30, %s4579_s1 }
   0x9   :  { %p3721_p2 = pnand %p3719_p1, %p3716_p0 }
   0xb   :  { %3724 = shalt.err (!%p3721_p2)
}
   0xc   :  { %s3725_s12 = scalar_lea.vmem %s35_s25, 256  ;;  %p3730_p4 = scmp.lt.s32.totalorder %s35_s25, %s35_s25 }
   0xd   :  { %p3726_p3 = scmp.ne.s32.totalorder %s35_s25, %s3725_s12  ;;  %p3731_p5 = scmp.lt.s32.totalorder %s3725_s12, %s3725_s12 }
   0xf   :  { %p3732_p6 = por %p3731_p5, %p3730_p4 }
  0x11   :  { %p3733_p7 = pnand %p3732_p6, %p3726_p3 }
  0x13   :  { %3736 = shalt.err (!%p3733_p7)
}
  0x14   :  { %s3903_s13 = smov 128   ;;  %s3904_s14 = smov 8  }
  0x15   :  { %40 = dma.hbm_to_vmem [thread:$0]  %s4579_s1, 256, %s35_s25, [#allocation6], %s3903_s13, %s3903_s13, %s3904_s14  }
  0x16   :  { %s3737_s19 = scalar_lea.hbm %s4581_s3, 32 }
  0x17   :  { %p3738_p8 = scmp.ne.s32.totalorder %s4581_s3, %s3737_s19  ;;  %p3741_p9 = scmp.lt.u32.totalorder %s3737_s19, %s4581_s3 }
  0x19   :  { %p3743_p10 = pnand %p3741_p9, %p3738_p8 }
  0x1b   :  { %3746 = shalt.err (!%p3743_p10)
}
  0x1c   :  { %s3747_s24 = scalar_lea.vmem %s60_s27, 32  ;;  %p3752_p12 = scmp.lt.s32.totalorder %s60_s27, %s60_s27 }
  0x1d   :  { %p3748_p11 = scmp.ne.s32.totalorder %s60_s27, %s3747_s24  ;;  %p3753_p13 = scmp.lt.s32.totalorder %s3747_s24, %s3747_s24 }
  0x1f   :  { %p3754_p0 = por %p3753_p13, %p3752_p12 }
  0x21   :  { %p3755_p1 = pnand %p3754_p0, %p3748_p11 }
  0x23   :  { %3758 = shalt.err (!%p3755_p1)
}
  0x24   :  { %62 = dma.hbm_to_vmem [thread:$0]  %s4581_s3, 32, %s60_s27, [#allocation9]  }
  0x25   :  { %s3905_s26 = smov [#allocation11]   ;;  %s3759_s8 = scalar_lea.hbm %s4583_s5, 1024 }
  0x26   :  { %s78_s28 = sshll.u32 %s3905_s26, 4  ;;  %p3760_p2 = scmp.ne.s32.totalorder %s4583_s5, %s3759_s8  ;;  %s79_s28 = int_to_ptr.vmem [resolvable:$true] %s78_s28 }
  0x27   :  { %p3763_p3 = scmp.lt.u32.totalorder %s3759_s8, %s4583_s5 }
  0x29   :  { %p3765_p4 = pnand %p3763_p3, %p3760_p2 }
  0x2b   :  { %3768 = shalt.err (!%p3765_p4)
}
  0x2c   :  { %s3769_s15 = scalar_lea.vmem %s79_s28, 1024  ;;  %p3774_p6 = scmp.lt.s32.totalorder %s79_s28, %s79_s28 }
  0x2d   :  { %p3770_p5 = scmp.ne.s32.totalorder %s79_s28, %s3769_s15  ;;  %p3775_p7 = scmp.lt.s32.totalorder %s3769_s15, %s3769_s15 }
  0x2f   :  { %p3776_p8 = por %p3775_p7, %p3774_p6 }
  0x31   :  { %p3777_p9 = pnand %p3776_p8, %p3770_p5 }
  0x33   :  { %3780 = shalt.err (!%p3777_p9)
}
  0x34   :  { %s3906_s3 = smov 256   ;;  %s3907_s27 = smov 16  }
  0x35   :  { %84 = dma.hbm_to_vmem [thread:$0]  %s4583_s5, 1024, %s79_s28, [#allocation12], %s3906_s3, %s3906_s3, %s3907_s27  }
  0x36   :  { %s3908_s18 = smov [#allocation2]   ;;  %s3909_s20 = smov [#allocation7]  }
  0x37   :  { %s22_s19 = sshll.u32 %s3908_s18, 4  ;;  %s46_s21 = sshll.u32 %s3909_s20, 4  ;;  %s23_s19 = int_to_ptr.vmem [resolvable:$true] %s22_s19  ;;  %s47_s21 = int_to_ptr.vmem [resolvable:$true] %s46_s21 }
  0x38   :  { %s3781_s24 = scalar_lea.hbm %s4578_s0, 256 }
  0x39   :  { %p3782_p10 = scmp.ne.s32.totalorder %s4578_s0, %s3781_s24  ;;  %p3785_p11 = scmp.lt.u32.totalorder %s3781_s24, %s4578_s0 }
  0x3b   :  { %p3787_p12 = pnand %p3785_p11, %p3782_p10 }
  0x3d   :  { %3790 = shalt.err (!%p3787_p12)
}
  0x3e   :  { %s3791_s5 = scalar_lea.vmem %s23_s19, 256  ;;  %p3796_p0 = scmp.lt.s32.totalorder %s23_s19, %s23_s19 }
  0x3f   :  { %p3792_p13 = scmp.ne.s32.totalorder %s23_s19, %s3791_s5  ;;  %p3797_p1 = scmp.lt.s32.totalorder %s3791_s5, %s3791_s5 }
  0x41   :  { %p3798_p2 = por %p3797_p1, %p3796_p0 }
  0x43   :  { %p3799_p3 = pnand %p3798_p2, %p3792_p13 }
  0x45   :  { %3802 = shalt.err (!%p3799_p3)
}
  0x46   :  { %28 = dma.hbm_to_vmem [thread:$0]  %s4578_s0, 256, %s23_s19, [#allocation3], %s3903_s13, %s3903_s13, %s3904_s14  }
  0x47   :  { %s3803_s10 = scalar_lea.hbm %s4580_s2, 256 }
  0x48   :  { %p3804_p4 = scmp.ne.s32.totalorder %s4580_s2, %s3803_s10  ;;  %p3807_p5 = scmp.lt.u32.totalorder %s3803_s10, %s4580_s2 }
  0x4a   :  { %p3809_p6 = pnand %p3807_p5, %p3804_p4 }
  0x4c   :  { %3812 = shalt.err (!%p3809_p6)
}
  0x4d   :  { %s3813_s27 = scalar_lea.vmem %s47_s21, 256  ;;  %p3818_p8 = scmp.lt.s32.totalorder %s47_s21, %s47_s21 }
  0x4e   :  { %p3814_p7 = scmp.ne.s32.totalorder %s47_s21, %s3813_s27  ;;  %p3819_p9 = scmp.lt.s32.totalorder %s3813_s27, %s3813_s27 }
  0x50   :  { %p3820_p10 = por %p3819_p9, %p3818_p8 }
  0x52   :  { %p3821_p11 = pnand %p3820_p10, %p3814_p7 }
  0x54   :  { %3824 = shalt.err (!%p3821_p11)
}
  0x55   :  { %s3910_s0 = smov 32   ;;  %s3911_s13 = smov 2  }
  0x56   :  { %52 = dma.hbm_to_vmem [thread:$0]  %s4580_s2, 256, %s47_s21, [#allocation6], %s3910_s0, %s3910_s0, %s3911_s13  }
  0x57   :  { %s3912_s17 = smov [#allocation10]   ;;  %s3913_s19 = smov [#allocation13]  }
  0x58   :  { %s69_s18 = sshll.u32 %s3912_s17, 4  ;;  %s91_s20 = sshll.u32 %s3913_s19, 4  ;;  %s70_s18 = int_to_ptr.vmem [resolvable:$true] %s69_s18  ;;  %s92_s20 = int_to_ptr.vmem [resolvable:$true] %s91_s20 }
  0x59   :  { %s3825_s24 = scalar_lea.hbm %s4582_s4, 32 }
  0x5a   :  { %p3826_p12 = scmp.ne.s32.totalorder %s4582_s4, %s3825_s24  ;;  %p3829_p13 = scmp.lt.u32.totalorder %s3825_s24, %s4582_s4 }
  0x5c   :  { %p3831_p0 = pnand %p3829_p13, %p3826_p12 }
  0x5e   :  { %3834 = shalt.err (!%p3831_p0)
}
  0x5f   :  { %s3835_s2 = scalar_lea.vmem %s70_s18, 32  ;;  %p3840_p2 = scmp.lt.s32.totalorder %s70_s18, %s70_s18 }
  0x60   :  { %p3836_p1 = scmp.ne.s32.totalorder %s70_s18, %s3835_s2  ;;  %p3841_p3 = scmp.lt.s32.totalorder %s3835_s2, %s3835_s2 }
  0x62   :  { %p3842_p4 = por %p3841_p3, %p3840_p2 }
  0x64   :  { %p3843_p5 = pnand %p3842_p4, %p3836_p1 }
  0x66   :  { %3846 = shalt.err (!%p3843_p5)
}
  0x67   :  { %72 = dma.hbm_to_vmem [thread:$0]  %s4582_s4, 32, %s70_s18, [#allocation9]  }
  0x68   :  { %s3847_s8 = scalar_lea.hbm %s4584_s6, 16 }
  0x69   :  { %p3848_p6 = scmp.ne.s32.totalorder %s4584_s6, %s3847_s8  ;;  %p3851_p7 = scmp.lt.u32.totalorder %s3847_s8, %s4584_s6 }
  0x6b   :  { %p3853_p8 = pnand %p3851_p7, %p3848_p6 }
  0x6d   :  { %3856 = shalt.err (!%p3853_p8)
}
  0x6e   :  { %s3857_s15 = scalar_lea.vmem %s92_s20, 16  ;;  %s3861_s3 = scalar_lea.vmem %s92_s20, 32 }
  0x6f   :  { %p3858_p9 = scmp.ne.s32.totalorder %s92_s20, %s3857_s15  ;;  %p3862_p10 = scmp.lt.s32.totalorder %s92_s20, %s92_s20 }
  0x70   :  { %p3863_p11 = scmp.lt.s32.totalorder %s3861_s3, %s3857_s15 }
  0x72   :  { %p3864_p12 = por %p3863_p11, %p3862_p10 }
  0x74   :  { %p3865_p13 = pnand %p3864_p12, %p3858_p9 }
  0x76   :  { %3868 = shalt.err (!%p3865_p13)
}
  0x77   :  { %94 = dma.hbm_to_vmem [thread:$0]  %s4584_s6, 16, %s92_s20, [#allocation12]  }
  0x78   :  { %3891 = dma.done.wait [#allocation3], 256  }
  0x79   :  { %3892 = vsyncadd [#allocation3], 4294967040 }
  0x7a   :  { %3893 = dma.done.wait [#allocation6], 512  }
  0x7b   :  { %3894 = vsyncadd [#allocation6], 4294966784 }
  0x7c   :  { %3895 = dma.done.wait [#allocation9], 64  }
  0x7d   :  { %3896 = vsyncadd [#allocation9], 4294967232 }
  0x7e   :  { %3897 = dma.done.wait [#allocation12], 1040  }
  0x7f   :  { %3898 = vsyncadd [#allocation12], 4294966256  ;;  %v3914_v0 = vmov 0.0   ;;  %v121_v1 = vld [vmem:[#allocation11 + $0x8] sm:$0xff]  ;;  %v123_v2 = vld [vmem:[#allocation11 + $0x18] sm:$0xff]  ;;  %vm131_vm0 = vcmask 261120   ;;  %v210_v16 = vlaneseq }
  0x80   :  { %199 = vmatprep.mubr.f32.mxu0 %v3914_v0  ;;  %3401 = vmatprep.subr.mxu1 %v3914_v0  ;;  %v120_v3 = vld [vmem:[#allocation11] sm:$0xff]  ;;  %v4055_v4 = vpack.c.bf16 %v123_v2, %v121_v1  ;;  %v122_v5 = vld [vmem:[#allocation11 + $0x10] sm:$0xff]  ;;  %v125_v6 = vld [vmem:[#allocation11 + $0x28] sm:$0xff]  ;;  %v3915_v14 = vmov 1966171168   ;;  %vm269_vm1 = vcmask 1041409  }
  0x81   :  { %v127_v7 = vld [vmem:[#allocation11 + $0x38] sm:$0xff]  ;;  %v4057_v8 = vpack.c.bf16 %v122_v5, %v120_v3  ;;  %v124_v10 = vld [vmem:[#allocation11 + $0x20] sm:$0xff]  ;;  %v126_v11 = vld [vmem:[#allocation11 + $0x30] sm:$0xff]  ;;  %v208_v15 = vunpack.c.l.s4 %v3915_v14  ;;  %v4069_v18 = vshrl.u32 %v210_v16, 7  ;;  %v4096_v40 = vand.u32 127, %v210_v16  ;;  %s3918_s6 = smov 64  }
  0x82   :  { %v4059_v9 = vpack.c.bf16 %v127_v7, %v125_v6  ;;  %3482 = vmatprep.subr.bf16.mxu0 %v4055_v4  ;;  %v4063_v12 = vpack.c.bf16 %v126_v11, %v124_v10  ;;  %v129_v13 = vld [vmem:[#allocation8] sm:$0x3]  ;;  %v4081_v26 = vld [vmem:[#allocation2] sm:$0xff]  ;;  %v4085_v29 = vld [vmem:[#allocation2 + $0x8] sm:$0xff]  ;;  %vm272_vm2 = vcmask 58368   ;;  %v3916_v48 = vmov 0  }
  0x83   :  { %3484 = vmatpush1.bf16.msra.mxu0 %v4057_v8  ;;  %v209_v17 = vunpack.c.0.s8 %v208_v15  ;;  %v4078_v23 = vsub.s32 0, %v4069_v18  ;;  %v4090_v33 = vld [vmem:[#allocation13] ss:$0 sm:$0xff]  ;;  %v4100_v42 = vsub.s32 %v4096_v40, %v4069_v18  ;;  %3565 = vset.pattern.permute.xlu0 %v3916_v48  ;;  %v4107_v49 = vsub.s32 1, %v4069_v18  ;;  %v4129_v16 = vld [vmem:[#allocation5 + $0x8] sm:$0xff]  ;;  %s3919_s14 = smov [#allocation14]  }
  0x84   :  { %3486 = vmatprep.subr.bf16.mxu0 %v4059_v9  ;;  %3564 = vset.pattern.permute.xlu1 %v3916_v48  ;;  %v4117_v10 = vld [vmem:[#allocation5] sm:$0xff]  ;;  %vm3917_vm3 = vmmov 0   ;;  %vm336_vm4 = vcmask 64512   ;;  %vm541_vm5 = vcmask 326656   ;;  %s3321_s16 = sshll.u32 %s3919_s14, 4  ;;  %s3322_s16 = int_to_ptr.vmem [resolvable:$true] %s3321_s16 }
  0x85   :  { %v4072_v19 = vsub.s32 %v209_v17, %v4069_v18  ;;  %3402 = vmatpush3.msra.mxu1 %v4117_v10  ;;  %3403 = vmatprep.mubr.msk.f32.mxu1 %vm3917_vm3, %v3914_v0  ;;  %s3869_s17 = scalar_lea.vmem %s3322_s16, 256  ;;  %p3874_p1 = scmp.lt.s32.totalorder %s3322_s16, %s3322_s16 }
  0x86   :  { %3406 = vmatprep.subr.mxu1 %v3914_v0  ;;  %p3870_p0 = scmp.ne.s32.totalorder %s3322_s16, %s3869_s17  ;;  %p3875_p2 = scmp.lt.s32.totalorder %s3869_s17, %s3869_s17 }
  0x87   :  { %3488 = vmatpush1.bf16.msra.mxu0 %v4063_v12 }
  0x88   :  { %3411 = vmatprep.subr.mxu0 %v3914_v0  ;;  %p3876_p3 = por %p3875_p2, %p3874_p1 }
  0x8a   :  { %3336 = vmatmul.mubr.msk.f32.vlgmr.msra.gmra.mrb[0].mxu0 %vm131_vm0, %v129_v13  ;;  %v130_v13 = vld [vmem:[#allocation10] sm:$0x3]  ;;  %p3877_p4 = pnand %p3876_p3, %p3870_p0 }
  0x8b   :  { %3412 = vmatpush3.msra.mxu0 %v4117_v10  ;;  %3413 = vmatprep.mubr.msk.f32.mxu0 %vm3917_vm3, %v3914_v0 }
  0x8c   :  { %3416 = vmatprep.subr.mxu0 %v3914_v0 }
 0x15d   :  { %v4074_v20 = vpop.f32.mrb[0].mxu0 }
 0x15e   :  { %v203_v21 = vpop.f32.mrb[1].mxu0 }
 0x15f   :  { %v213_v22 = vrot.slane %v203_v21, %v4072_v19 }
 0x161   :  { %v214_v24 = vcombine.high %v213_v22, %v213_v22  ;;  %v221_v25 = vrot.slane %v213_v22, %v4072_v19 }
 0x163   :  { %v228_v27 = vrot.slane %v214_v24, %v4072_v19  ;;  %v232_v28 = vrot.slane %v221_v25, %v4078_v23  ;;  %v489_v25 = vld [vmem:[#allocation7] sm:$0x3] }
 0x165   :  { %v236_v30 = vrot.slane %v228_v27, %v4078_v23  ;;  %v239_v31 = vadd.f32 %v232_v28, %v4081_v26 }
 0x167   :  { %v240_v32 = vadd.f32 %v236_v30, %v4085_v29  ;;  %3566 = vtanh.f32 %v239_v31  ;;  %v490_v31 = vadd.f32 %v489_v25, %v4074_v20 }
 0x169   :  { %3568 = vtanh.f32 %v240_v32 }
 0x171   :  { %v3567_v34 = vpop.eup %3566 }
 0x172   :  { %v249_v35 = vmul.f32 %v3567_v34, %v4090_v33 }
 0x173   :  { %v3569_v36 = vpop.eup %3568 }
 0x174   :  { %v251_v37 = vsel %vm131_vm0, %v249_v35, 0.0  ;;  %v250_v38 = vmul.f32 %v3569_v36, %v4090_v33 }
 0x175   :  { %252 = vadd.xlane.f32.xlu0 %v251_v37 }
 0x176   :  { %v254_v39 = vsel %vm131_vm0, %v250_v38, 0.0 }
 0x179   :  { %255 = vadd.xlane.f32.xlu0 %v254_v39 }
 0x202   :  { %v253_v41 = vpop.xlane.xlu0 %252 }
 0x203   :  { %v264_v44 = vrot.slane %v253_v41, %v4100_v42 }
 0x206   :  { %v256_v43 = vpop.xlane.xlu0 %255 }
 0x207   :  { %v268_v45 = vrot.slane %v256_v43, %v4100_v42 }
 0x209   :  { %v270_v46 = vsel %vm269_vm1, %v268_v45, %v264_v44 }
 0x20a   :  { %v273_v47 = vsel %vm272_vm2, %v270_v46, -inf }
 0x20b   :  { %274 = vmax.xlane.f32.xlu1 %v273_v47 }
 0x298   :  { %v275_v50 = vpop.xlane.xlu1 %274 }
 0x299   :  { %v280_v51 = vrot.slane %v275_v50, %v4078_v23  ;;  %v284_v52 = vrot.slane %v275_v50, %v4107_v49 }
 0x29b   :  { %v287_v53 = vsub.f32 %v253_v41, %v280_v51  ;;  %v288_v54 = vsub.f32 %v256_v43, %v284_v52  ;;  %v529_v51 = vadd.s32 4294967264, %v4096_v40 }
 0x29d   :  { %v289_v55 = vmul.f32 1.442695, %v287_v53  ;;  %v291_v56 = vmul.f32 1.442695, %v288_v54  ;;  %v4154_v52 = vsub.s32 %v529_v51, %v4069_v18 }
 0x29f   :  { %3570 = vpow2.f32 %v289_v55 }
 0x2a0   :  { %3572 = vpow2.f32 %v291_v56 }
 0x2a9   :  { %v3571_v57 = vpop.eup %3570 }
 0x2aa   :  { %v3573_v58 = vpop.eup %3572  ;;  %296 = vperm.xlu1 %3564, %v3571_v57  }
 0x2ab   :  { %299 = vperm.xlu0 %3565, %v3573_v58  }
 0x329   :  { %v297_v59 = vpop.permute.xlu1 %296 }
 0x32a   :  { %v300_v60 = vpop.permute.xlu0 %299  ;;  %v304_v61 = vrot.slane %v297_v59, %v4100_v42 }
 0x32b   :  { %v308_v62 = vrot.slane %v300_v60, %v4100_v42 }
 0x32d   :  { %v309_v63 = vsel %vm269_vm1, %v308_v62, %v304_v61 }
 0x32e   :  { %v311_v1 = vsel %vm272_vm2, %v309_v63, 0.0 }
 0x32f   :  { %312 = vadd.xlane.f32.xlu1 %v311_v1 }
 0x3bc   :  { %v313_v2 = vpop.xlane.xlu1 %312 }
 0x3bd   :  { %3574 = vrcp.f32 %v313_v2 }
 0x3c7   :  { %v3575_v3 = vpop.eup %3574 }
 0x3c8   :  { %v319_v5 = vrot.slane %v3575_v3, %v4078_v23  ;;  %v323_v7 = vrot.slane %v3575_v3, %v4107_v49 }
 0x3ca   :  { %v326_v6 = vmul.f32 %v3571_v57, %v319_v5  ;;  %v327_v11 = vmul.f32 %v3573_v58, %v323_v7 }
 0x3cc   :  { %330 = vperm.xlu0 %3565, %v326_v6  }
 0x3d0   :  { %411 = vperm.xlu0 %3565, %v327_v11  }
 0x3d4   :  { %505 = vrot.lane.b32.xlu0 %v130_v13, %s3910_s0 }
 0x44b   :  { %v331_v14 = vpop.permute.xlu0 %330 }
 0x44c   :  { %v335_v15 = vrot.slane %v331_v14, %v4100_v42  ;;  %v533_v54 = vrot.slane %v331_v14, %v4154_v52 }
 0x44e   :  { %3404 = vmatmul.mubr.msk.f32.vlgmr.msra.gmra.mrb[0].mxu1 %vm336_vm4, %v335_v15 }
 0x44f   :  { %3407 = vmatpush3.msra.mxu1 %v4129_v16  ;;  %v412_v17 = vpop.permute.xlu0 %411  ;;  %3408 = vmatprep.mubr.msk.f32.mxu1 %vm3917_vm3, %v3914_v0 }
 0x450   :  { %v416_v21 = vrot.slane %v412_v17, %v4100_v42  ;;  %3490 = vmatprep.subr.bf16.mxu1 %v4055_v4  ;;  %v537_v53 = vrot.slane %v412_v17, %v4154_v52 }
 0x452   :  { %3409 = vmatmul.mubr.msk.f32.vlgmr.msra.gmra.mrb[2].mxu1 %vm336_vm4, %v416_v21  ;;  %v538_v55 = vsel %vm269_vm1, %v537_v53, %v533_v54 }
 0x453   :  { %3492 = vmatpush1.bf16.msra.mxu1 %v4057_v8  ;;  %610 = vmatprep.mubr.f32.mxu1 %v3914_v0  ;;  %v506_v44 = vpop.permute.xlu0 %505 }
 0x454   :  { %3494 = vmatprep.subr.bf16.mxu1 %v4059_v9 }
 0x457   :  { %3496 = vmatpush1.bf16.msra.mxu1 %v4063_v12 }
 0x458   :  { %3498 = vmatprep.subr.bf16.mxu1 %v4055_v4 }
 0x521   :  { %v405_v22 = vpop.f32.mrb[0].mxu1 }
 0x522   :  { %v3405_v24 = vpop.f32.mrb[1].mxu1 }
 0x525   :  { %v485_v27 = vpop.f32.mrb[2].mxu1 }
 0x526   :  { %v493_v28 = vrot.slane %v485_v27, 7  ;;  %v3410_v30 = vpop.f32.mrb[3].mxu1 }
 0x528   :  { %v494_v32 = vsel %vm269_vm1, %v493_v28, %v405_v22 }
 0x529   :  { %v496_v34 = vadd.f32 %v494_v32, %v490_v31 }
 0x52b   :  { %3576 = vtanh.f32 %v496_v34  ;;  %v3340_v36 = vmul.f32 -1.442695, %v496_v34 }
 0x52d   :  { %3578 = vpow2.f32 %v3340_v36 }
 0x535   :  { %v3577_v35 = vpop.eup %3576 }
 0x536   :  { %510 = vrot.lane.b32.xlu1 %v3577_v35, %s3918_s6 }
 0x537   :  { %v3579_v37 = vpop.eup %3578 }
 0x538   :  { %v500_v38 = vadd.f32 1.0, %v3579_v37 }
 0x53a   :  { %3580 = vrcp.f32 %v500_v38 }
 0x544   :  { %v3581_v39 = vpop.eup %3580 }
 0x545   :  { %v508_v20 = vmul.f32 %v3581_v39, %v506_v44 }
 0x5a8   :  { %v511_v41 = vpop.permute.xlu1 %510 }
 0x5a9   :  { %v513_v43 = vmul.f32 %v3581_v39, %v511_v41 }
 0x5ab   :  { %515 = vrot.lane.b32.xlu0 %v513_v43, %s3910_s0 }
 0x61d   :  { %v516_v45 = vpop.permute.xlu0 %515 }
 0x61e   :  { %v4147_v46 = vadd.f32 %v516_v45, %v508_v20 }
 0x620   :  { %3582 = vtanh.f32 %v4147_v46 }
 0x62a   :  { %v3583_v47 = vpop.eup %3582 }
 0x62b   :  { %521 = vrot.lane.b32.xlu0 %v3583_v47, %s3918_s6 }
 0x69d   :  { %v522_v48 = vpop.permute.xlu0 %521 }
 0x69e   :  { %v524_v50 = vmul.f32 %v3581_v39, %v522_v48 }
 0x6a0   :  { %526 = vrot.lane.b32.xlu0 %v524_v50, %s3910_s0 }
 0x712   :  { %v527_v56 = vpop.permute.xlu0 %526 }
 0x713   :  { %v540_v57 = vsel %vm131_vm0, %v527_v56, %v538_v55  ;;  %3341 = vmatmul.mubr.msk.f32.vlgmr.msra.gmra.mrb[4].mxu1 %vm131_vm0, %v527_v56 }
 0x714   :  { %v542_v58 = vsel %vm541_vm5, %v540_v57, 0.0  ;;  %3500 = vmatpush1.bf16.msra.mxu1 %v4057_v8  ;;  %1006 = vmatprep.mubr.f32.mxu1 %v3914_v0 }
 0x715   :  { %543 = vst [vmem:[#allocation14] sm:$0x3] %v542_v58  ;;  %3502 = vmatprep.subr.bf16.mxu1 %v4059_v9 }
 0x718   :  { %3504 = vmatpush1.bf16.msra.mxu1 %v4063_v12 }
 0x719   :  { %3506 = vmatprep.subr.bf16.mxu1 %v4055_v4 }
 0x7e6   :  { %v4167_v18 = vpop.f32.mrb[4].mxu1 }
 0x7e7   :  { %v614_v40 = vpop.f32.mrb[5].mxu1 }
 0x7e8   :  { %v624_v59 = vrot.slane %v614_v40, %v4072_v19 }
 0x7ea   :  { %v625_v60 = vcombine.high %v624_v59, %v624_v59  ;;  %v632_v61 = vrot.slane %v624_v59, %v4072_v19  ;;  %v890_v59 = vld [vmem:[#allocation7 + $0x2] sm:$0x3] }
 0x7ec   :  { %v639_v62 = vrot.slane %v625_v60, %v4072_v19  ;;  %v643_v63 = vrot.slane %v632_v61, %v4078_v23 }
 0x7ee   :  { %v647_v1 = vrot.slane %v639_v62, %v4078_v23  ;;  %v650_v2 = vadd.f32 %v643_v63, %v4081_v26  ;;  %v891_v63 = vadd.f32 %v890_v59, %v4167_v18 }
 0x7f0   :  { %v651_v3 = vadd.f32 %v647_v1, %v4085_v29  ;;  %3584 = vtanh.f32 %v650_v2 }
 0x7f2   :  { %3586 = vtanh.f32 %v651_v3 }
 0x7fa   :  { %v3585_v5 = vpop.eup %3584 }
 0x7fb   :  { %v654_v6 = vmul.f32 %v3585_v5, %v4090_v33 }
 0x7fc   :  { %v3587_v7 = vpop.eup %3586 }
 0x7fd   :  { %v656_v11 = vsel %vm131_vm0, %v654_v6, 0.0  ;;  %v655_v13 = vmul.f32 %v3587_v7, %v4090_v33 }
 0x7fe   :  { %657 = vadd.xlane.f32.xlu1 %v656_v11 }
 0x7ff   :  { %v659_v14 = vsel %vm131_vm0, %v655_v13, 0.0 }
 0x800   :  { %660 = vadd.xlane.f32.xlu0 %v659_v14 }
 0x88b   :  { %v658_v15 = vpop.xlane.xlu1 %657 }
 0x88c   :  { %v667_v21 = vrot.slane %v658_v15, %v4100_v42 }
 0x88d   :  { %v661_v17 = vpop.xlane.xlu0 %660 }
 0x88e   :  { %v671_v22 = vrot.slane %v661_v17, %v4100_v42 }
 0x890   :  { %v672_v24 = vsel %vm269_vm1, %v671_v22, %v667_v21 }
 0x891   :  { %v674_v25 = vsel %vm272_vm2, %v672_v24, -inf }
 0x892   :  { %675 = vmax.xlane.f32.xlu0 %v674_v25 }
 0x91f   :  { %v676_v27 = vpop.xlane.xlu0 %675 }
 0x920   :  { %v681_v28 = vrot.slane %v676_v27, %v4078_v23  ;;  %v685_v30 = vrot.slane %v676_v27, %v4107_v49 }
 0x922   :  { %v688_v31 = vsub.f32 %v658_v15, %v681_v28  ;;  %v689_v32 = vsub.f32 %v661_v17, %v685_v30 }
 0x924   :  { %v690_v34 = vmul.f32 1.442695, %v688_v31  ;;  %v692_v35 = vmul.f32 1.442695, %v689_v32 }
 0x926   :  { %3588 = vpow2.f32 %v690_v34 }
 0x927   :  { %3590 = vpow2.f32 %v692_v35 }
 0x930   :  { %v3589_v36 = vpop.eup %3588 }
 0x931   :  { %v3591_v37 = vpop.eup %3590  ;;  %697 = vperm.xlu1 %3564, %v3589_v36  }
 0x932   :  { %700 = vperm.xlu0 %3565, %v3591_v37  }
 0x9b0   :  { %v698_v38 = vpop.permute.xlu1 %697 }
 0x9b1   :  { %v701_v39 = vpop.permute.xlu0 %700  ;;  %v705_v41 = vrot.slane %v698_v38, %v4100_v42 }
 0x9b2   :  { %v709_v43 = vrot.slane %v701_v39, %v4100_v42 }
 0x9b4   :  { %v710_v44 = vsel %vm269_vm1, %v709_v43, %v705_v41 }
 0x9b5   :  { %v712_v20 = vsel %vm272_vm2, %v710_v44, 0.0 }
 0x9b6   :  { %713 = vadd.xlane.f32.xlu1 %v712_v20 }
 0xa43   :  { %v714_v45 = vpop.xlane.xlu1 %713 }
 0xa44   :  { %3592 = vrcp.f32 %v714_v45 }
 0xa4e   :  { %v3593_v47 = vpop.eup %3592 }
 0xa4f   :  { %v720_v48 = vrot.slane %v3593_v47, %v4078_v23  ;;  %v724_v51 = vrot.slane %v3593_v47, %v4107_v49 }
 0xa51   :  { %v727_v50 = vmul.f32 %v3589_v36, %v720_v48  ;;  %v728_v53 = vmul.f32 %v3591_v37, %v724_v51 }
 0xa53   :  { %731 = vperm.xlu0 %3565, %v727_v50  }
 0xa57   :  { %811 = vperm.xlu0 %3565, %v728_v53  }
 0xad2   :  { %v732_v54 = vpop.permute.xlu0 %731 }
 0xad3   :  { %v736_v55 = vrot.slane %v732_v54, %v4100_v42  ;;  %v929_v27 = vrot.slane %v732_v54, %v4154_v52 }
 0xad5   :  { %3414 = vmatmul.mubr.msk.f32.vlgmr.msra.gmra.mrb[2].mxu0 %vm336_vm4, %v736_v55 }
 0xad6   :  { %3417 = vmatpush3.msra.mxu0 %v4129_v16  ;;  %v812_v56 = vpop.permute.xlu0 %811  ;;  %3418 = vmatprep.mubr.msk.f32.mxu0 %vm3917_vm3, %v3914_v0 }
 0xad7   :  { %v816_v57 = vrot.slane %v812_v56, %v4100_v42  ;;  %3421 = vmatprep.subr.mxu0 %v3914_v0  ;;  %v933_v25 = vrot.slane %v812_v56, %v4154_v52 }
 0xad9   :  { %3419 = vmatmul.mubr.msk.f32.vlgmr.msra.gmra.mrb[4].mxu0 %vm336_vm4, %v816_v57  ;;  %v934_v28 = vsel %vm269_vm1, %v933_v25, %v929_v27 }
 0xada   :  { %3422 = vmatpush3.msra.mxu0 %v4117_v10  ;;  %3423 = vmatprep.mubr.msk.f32.mxu0 %vm3917_vm3, %v3914_v0 }
 0xadb   :  { %3426 = vmatprep.subr.mxu0 %v3914_v0 }
 0xba8   :  { %v805_v58 = vpop.f32.mrb[2].mxu0 }
 0xba9   :  { %v3415_v40 = vpop.f32.mrb[3].mxu0 }
 0xbac   :  { %v885_v60 = vpop.f32.mrb[4].mxu0 }
 0xbad   :  { %v894_v61 = vrot.slane %v885_v60, 7  ;;  %v3420_v62 = vpop.f32.mrb[5].mxu0 }
 0xbaf   :  { %v895_v1 = vsel %vm269_vm1, %v894_v61, %v805_v58 }
 0xbb0   :  { %v897_v2 = vadd.f32 %v895_v1, %v891_v63 }
 0xbb2   :  { %3594 = vtanh.f32 %v897_v2  ;;  %v3344_v5 = vmul.f32 -1.442695, %v897_v2 }
 0xbb4   :  { %3596 = vpow2.f32 %v3344_v5 }
 0xbbc   :  { %v3595_v3 = vpop.eup %3594 }
 0xbbd   :  { %907 = vrot.lane.b32.xlu0 %v3595_v3, %s3918_s6 }
 0xbbe   :  { %v3597_v6 = vpop.eup %3596 }
 0xbbf   :  { %v901_v7 = vadd.f32 1.0, %v3597_v6 }
 0xbc1   :  { %3598 = vrcp.f32 %v901_v7 }
 0xbcb   :  { %v3599_v11 = vpop.eup %3598 }
 0xbcc   :  { %v905_v15 = vmul.f32 %v3599_v11, %v4147_v46 }
 0xc2f   :  { %v908_v13 = vpop.permute.xlu0 %907 }
 0xc30   :  { %v910_v14 = vmul.f32 %v3599_v11, %v908_v13 }
 0xc32   :  { %912 = vrot.lane.b32.xlu0 %v910_v14, %s3910_s0 }
 0xca4   :  { %v913_v18 = vpop.permute.xlu0 %912 }
 0xca5   :  { %v4209_v17 = vadd.f32 %v913_v18, %v905_v15 }
 0xca7   :  { %3600 = vtanh.f32 %v4209_v17 }
 0xcb1   :  { %v3601_v21 = vpop.eup %3600 }
 0xcb2   :  { %918 = vrot.lane.b32.xlu0 %v3601_v21, %s3918_s6 }
 0xd24   :  { %v919_v22 = vpop.permute.xlu0 %918 }
 0xd25   :  { %v921_v24 = vmul.f32 %v3599_v11, %v919_v22 }
 0xd27   :  { %923 = vrot.lane.b32.xlu0 %v921_v24, %s3910_s0 }
 0xd99   :  { %v924_v30 = vpop.permute.xlu0 %923 }
 0xd9a   :  { %v936_v46 = vsel %vm131_vm0, %v924_v30, %v934_v28  ;;  %3345 = vmatmul.mubr.msk.f32.vlgmr.msra.gmra.mrb[6].mxu1 %vm131_vm0, %v924_v30 }
 0xd9b   :  { %v937_v31 = vsel %vm541_vm5, %v936_v46, 0.0  ;;  %3508 = vmatpush1.bf16.msra.mxu1 %v4057_v8  ;;  %1402 = vmatprep.mubr.f32.mxu1 %v3914_v0 }
 0xd9c   :  { %939 = vst [vmem:[#allocation14 + $0x2] sm:$0x3] %v937_v31  ;;  %3510 = vmatprep.subr.bf16.mxu1 %v4059_v9 }
 0xd9f   :  { %3512 = vmatpush1.bf16.msra.mxu1 %v4063_v12 }
 0xda0   :  { %3514 = vmatprep.subr.bf16.mxu1 %v4055_v4 }
 0xe6d   :  { %v4225_v32 = vpop.f32.mrb[6].mxu1 }
 0xe6e   :  { %v1010_v34 = vpop.f32.mrb[7].mxu1 }
 0xe6f   :  { %v1020_v35 = vrot.slane %v1010_v34, %v4072_v19 }
 0xe71   :  { %v1021_v36 = vcombine.high %v1020_v35, %v1020_v35  ;;  %v1028_v37 = vrot.slane %v1020_v35, %v4072_v19  ;;  %v1286_v35 = vld [vmem:[#allocation7 + $0x4] sm:$0x3] }
 0xe73   :  { %v1035_v38 = vrot.slane %v1021_v36, %v4072_v19  ;;  %v1039_v39 = vrot.slane %v1028_v37, %v4078_v23 }
 0xe75   :  { %v1043_v41 = vrot.slane %v1035_v38, %v4078_v23  ;;  %v1046_v43 = vadd.f32 %v1039_v39, %v4081_v26  ;;  %v1287_v39 = vadd.f32 %v1286_v35, %v4225_v32 }
 0xe77   :  { %v1047_v44 = vadd.f32 %v1043_v41, %v4085_v29  ;;  %3602 = vtanh.f32 %v1046_v43 }
 0xe79   :  { %3604 = vtanh.f32 %v1047_v44 }
 0xe81   :  { %v3603_v20 = vpop.eup %3602 }
 0xe82   :  { %v1050_v45 = vmul.f32 %v3603_v20, %v4090_v33 }
 0xe83   :  { %v3605_v47 = vpop.eup %3604 }
 0xe84   :  { %v1052_v48 = vsel %vm131_vm0, %v1050_v45, 0.0  ;;  %v1051_v50 = vmul.f32 %v3605_v47, %v4090_v33 }
 0xe85   :  { %1053 = vadd.xlane.f32.xlu0 %v1052_v48 }
 0xe86   :  { %v1055_v51 = vsel %vm131_vm0, %v1051_v50, 0.0 }
 0xe87   :  { %1056 = vadd.xlane.f32.xlu1 %v1055_v51 }
 0xf12   :  { %v1054_v53 = vpop.xlane.xlu0 %1053 }
 0xf13   :  { %v1063_v55 = vrot.slane %v1054_v53, %v4100_v42 }
 0xf14   :  { %v1057_v54 = vpop.xlane.xlu1 %1056 }
 0xf15   :  { %v1067_v56 = vrot.slane %v1057_v54, %v4100_v42 }
 0xf17   :  { %v1068_v57 = vsel %vm269_vm1, %v1067_v56, %v1063_v55 }
 0xf18   :  { %v1070_v58 = vsel %vm272_vm2, %v1068_v57, -inf }
 0xf19   :  { %1071 = vmax.xlane.f32.xlu1 %v1070_v58 }
 0xfa6   :  { %v1072_v40 = vpop.xlane.xlu1 %1071 }
 0xfa7   :  { %v1077_v59 = vrot.slane %v1072_v40, %v4078_v23  ;;  %v1081_v60 = vrot.slane %v1072_v40, %v4107_v49 }
 0xfa9   :  { %v1084_v61 = vsub.f32 %v1054_v53, %v1077_v59  ;;  %v1085_v62 = vsub.f32 %v1057_v54, %v1081_v60 }
 0xfab   :  { %v1086_v63 = vmul.f32 1.442695, %v1084_v61  ;;  %v1088_v1 = vmul.f32 1.442695, %v1085_v62 }
 0xfad   :  { %3606 = vpow2.f32 %v1086_v63 }
 0xfae   :  { %3608 = vpow2.f32 %v1088_v1 }
 0xfb7   :  { %v3607_v2 = vpop.eup %3606 }
 0xfb8   :  { %v3609_v3 = vpop.eup %3608  ;;  %1093 = vperm.xlu1 %3564, %v3607_v2  }
 0xfb9   :  { %1096 = vperm.xlu0 %3565, %v3609_v3  }
0x1037   :  { %v1094_v5 = vpop.permute.xlu1 %1093 }
0x1038   :  { %v1097_v6 = vpop.permute.xlu0 %1096  ;;  %v1101_v7 = vrot.slane %v1094_v5, %v4100_v42 }
0x1039   :  { %v1105_v11 = vrot.slane %v1097_v6, %v4100_v42 }
0x103b   :  { %v1106_v13 = vsel %vm269_vm1, %v1105_v11, %v1101_v7 }
0x103c   :  { %v1108_v14 = vsel %vm272_vm2, %v1106_v13, 0.0 }
0x103d   :  { %1109 = vadd.xlane.f32.xlu1 %v1108_v14 }
0x10ca   :  { %v1110_v15 = vpop.xlane.xlu1 %1109 }
0x10cb   :  { %3610 = vrcp.f32 %v1110_v15 }
0x10d5   :  { %v3611_v18 = vpop.eup %3610 }
0x10d6   :  { %v1116_v21 = vrot.slane %v3611_v18, %v4078_v23  ;;  %v1120_v24 = vrot.slane %v3611_v18, %v4107_v49 }
0x10d8   :  { %v1123_v22 = vmul.f32 %v3607_v2, %v1116_v21  ;;  %v1124_v25 = vmul.f32 %v3609_v3, %v1120_v24 }
0x10da   :  { %1127 = vperm.xlu0 %3565, %v1123_v22  }
0x10de   :  { %1207 = vperm.xlu0 %3565, %v1124_v25  }
0x1159   :  { %v1128_v27 = vpop.permute.xlu0 %1127 }
0x115a   :  { %v1132_v28 = vrot.slane %v1128_v27, %v4100_v42  ;;  %v1325_v40 = vrot.slane %v1128_v27, %v4154_v52 }
0x115c   :  { %3424 = vmatmul.mubr.msk.f32.vlgmr.msra.gmra.mrb[6].mxu0 %vm336_vm4, %v1132_v28 }
0x115d   :  { %3427 = vmatpush3.msra.mxu0 %v4129_v16  ;;  %v1208_v30 = vpop.permute.xlu0 %1207  ;;  %3428 = vmatprep.mubr.msk.f32.mxu0 %vm3917_vm3, %v3914_v0 }
0x115e   :  { %v1212_v46 = vrot.slane %v1208_v30, %v4100_v42  ;;  %3431 = vmatprep.subr.mxu0 %v3914_v0  ;;  %v1329_v58 = vrot.slane %v1208_v30, %v4154_v52 }
0x1160   :  { %3429 = vmatmul.mubr.msk.f32.vlgmr.msra.gmra.mrb[8].mxu0 %vm336_vm4, %v1212_v46  ;;  %v1330_v59 = vsel %vm269_vm1, %v1329_v58, %v1325_v40 }
0x1161   :  { %3432 = vmatpush3.msra.mxu0 %v4117_v10  ;;  %3433 = vmatprep.mubr.msk.f32.mxu0 %vm3917_vm3, %v3914_v0 }
0x1162   :  { %3436 = vmatprep.subr.mxu0 %v3914_v0 }
0x122f   :  { %v1201_v31 = vpop.f32.mrb[6].mxu0 }
0x1230   :  { %v3425_v34 = vpop.f32.mrb[7].mxu0 }
0x1233   :  { %v1281_v36 = vpop.f32.mrb[8].mxu0 }
0x1234   :  { %v1290_v37 = vrot.slane %v1281_v36, 7  ;;  %v3430_v38 = vpop.f32.mrb[9].mxu0 }
0x1236   :  { %v1291_v41 = vsel %vm269_vm1, %v1290_v37, %v1201_v31 }
0x1237   :  { %v1293_v43 = vadd.f32 %v1291_v41, %v1287_v39 }
0x1239   :  { %3612 = vtanh.f32 %v1293_v43  ;;  %v3348_v20 = vmul.f32 -1.442695, %v1293_v43 }
0x123b   :  { %3614 = vpow2.f32 %v3348_v20 }
0x1243   :  { %v3613_v44 = vpop.eup %3612 }
0x1244   :  { %1303 = vrot.lane.b32.xlu0 %v3613_v44, %s3918_s6 }
0x1245   :  { %v3615_v45 = vpop.eup %3614 }
0x1246   :  { %v1297_v47 = vadd.f32 1.0, %v3615_v45 }
0x1248   :  { %3616 = vrcp.f32 %v1297_v47 }
0x1252   :  { %v3617_v48 = vpop.eup %3616 }
0x1253   :  { %v1301_v53 = vmul.f32 %v3617_v48, %v4209_v17 }
0x12b6   :  { %v1304_v50 = vpop.permute.xlu0 %1303 }
0x12b7   :  { %v1306_v51 = vmul.f32 %v3617_v48, %v1304_v50 }
0x12b9   :  { %1308 = vrot.lane.b32.xlu0 %v1306_v51, %s3910_s0 }
0x132b   :  { %v1309_v32 = vpop.permute.xlu0 %1308 }
0x132c   :  { %v4267_v54 = vadd.f32 %v1309_v32, %v1301_v53 }
0x132e   :  { %3618 = vtanh.f32 %v4267_v54 }
0x1338   :  { %v3619_v55 = vpop.eup %3618 }
0x1339   :  { %1314 = vrot.lane.b32.xlu1 %v3619_v55, %s3918_s6 }
0x13ab   :  { %v1315_v56 = vpop.permute.xlu1 %1314 }
0x13ac   :  { %v1317_v57 = vmul.f32 %v3617_v48, %v1315_v56 }
0x13ae   :  { %1319 = vrot.lane.b32.xlu0 %v1317_v57, %s3910_s0 }
0x1420   :  { %v1320_v60 = vpop.permute.xlu0 %1319 }
0x1421   :  { %v1332_v17 = vsel %vm131_vm0, %v1320_v60, %v1330_v59  ;;  %3349 = vmatmul.mubr.msk.f32.vlgmr.msra.gmra.mrb[8].mxu1 %vm131_vm0, %v1320_v60 }
0x1422   :  { %v1333_v61 = vsel %vm541_vm5, %v1332_v17, 0.0  ;;  %3516 = vmatpush1.bf16.msra.mxu1 %v4057_v8  ;;  %1798 = vmatprep.mubr.f32.mxu1 %v3914_v0 }
0x1423   :  { %1335 = vst [vmem:[#allocation14 + $0x4] sm:$0x3] %v1333_v61  ;;  %3518 = vmatprep.subr.bf16.mxu1 %v4059_v9 }
0x1426   :  { %3520 = vmatpush1.bf16.msra.mxu1 %v4063_v12 }
0x1427   :  { %3522 = vmatprep.subr.bf16.mxu1 %v4055_v4 }
0x14f4   :  { %v4283_v62 = vpop.f32.mrb[8].mxu1 }
0x14f5   :  { %v1406_v63 = vpop.f32.mrb[9].mxu1 }
0x14f6   :  { %v1416_v1 = vrot.slane %v1406_v63, %v4072_v19 }
0x14f8   :  { %v1417_v2 = vcombine.high %v1416_v1, %v1416_v1  ;;  %v1424_v3 = vrot.slane %v1416_v1, %v4072_v19  ;;  %v1682_v1 = vld [vmem:[#allocation7 + $0x6] sm:$0x3] }
0x14fa   :  { %v1431_v5 = vrot.slane %v1417_v2, %v4072_v19  ;;  %v1435_v6 = vrot.slane %v1424_v3, %v4078_v23 }
0x14fc   :  { %v1439_v7 = vrot.slane %v1431_v5, %v4078_v23  ;;  %v1442_v11 = vadd.f32 %v1435_v6, %v4081_v26  ;;  %v1683_v6 = vadd.f32 %v1682_v1, %v4283_v62 }
0x14fe   :  { %v1443_v13 = vadd.f32 %v1439_v7, %v4085_v29  ;;  %3620 = vtanh.f32 %v1442_v11 }
0x1500   :  { %3622 = vtanh.f32 %v1443_v13 }
0x1508   :  { %v3621_v14 = vpop.eup %3620 }
0x1509   :  { %v1446_v15 = vmul.f32 %v3621_v14, %v4090_v33 }
0x150a   :  { %v3623_v18 = vpop.eup %3622 }
0x150b   :  { %v1448_v21 = vsel %vm131_vm0, %v1446_v15, 0.0  ;;  %v1447_v22 = vmul.f32 %v3623_v18, %v4090_v33 }
0x150c   :  { %1449 = vadd.xlane.f32.xlu0 %v1448_v21 }
0x150d   :  { %v1451_v24 = vsel %vm131_vm0, %v1447_v22, 0.0 }
0x150e   :  { %1452 = vadd.xlane.f32.xlu1 %v1451_v24 }
0x1599   :  { %v1450_v25 = vpop.xlane.xlu0 %1449 }
0x159a   :  { %v1459_v28 = vrot.slane %v1450_v25, %v4100_v42 }
0x159b   :  { %v1453_v27 = vpop.xlane.xlu1 %1452 }
0x159c   :  { %v1463_v30 = vrot.slane %v1453_v27, %v4100_v42 }
0x159e   :  { %v1464_v46 = vsel %vm269_vm1, %v1463_v30, %v1459_v28 }
0x159f   :  { %v1466_v31 = vsel %vm272_vm2, %v1464_v46, -inf }
0x15a0   :  { %1467 = vmax.xlane.f32.xlu0 %v1466_v31 }
0x162d   :  { %v1468_v34 = vpop.xlane.xlu0 %1467 }
0x162e   :  { %v1473_v35 = vrot.slane %v1468_v34, %v4078_v23  ;;  %v1477_v36 = vrot.slane %v1468_v34, %v4107_v49 }
0x1630   :  { %v1480_v37 = vsub.f32 %v1450_v25, %v1473_v35  ;;  %v1481_v38 = vsub.f32 %v1453_v27, %v1477_v36 }
0x1632   :  { %v1482_v39 = vmul.f32 1.442695, %v1480_v37  ;;  %v1484_v41 = vmul.f32 1.442695, %v1481_v38 }
0x1634   :  { %3624 = vpow2.f32 %v1482_v39 }
0x1635   :  { %3626 = vpow2.f32 %v1484_v41 }
0x163e   :  { %v3625_v43 = vpop.eup %3624 }
0x163f   :  { %v3627_v44 = vpop.eup %3626  ;;  %1489 = vperm.xlu0 %3565, %v3625_v43  }
0x1640   :  { %1492 = vperm.xlu1 %3564, %v3627_v44  }
0x16be   :  { %v1490_v20 = vpop.permute.xlu0 %1489 }
0x16bf   :  { %v1493_v45 = vpop.permute.xlu1 %1492  ;;  %v1497_v47 = vrot.slane %v1490_v20, %v4100_v42 }
0x16c0   :  { %v1501_v48 = vrot.slane %v1493_v45, %v4100_v42 }
0x16c2   :  { %v1502_v50 = vsel %vm269_vm1, %v1501_v48, %v1497_v47 }
0x16c3   :  { %v1504_v51 = vsel %vm272_vm2, %v1502_v50, 0.0 }
0x16c4   :  { %1505 = vadd.xlane.f32.xlu0 %v1504_v51 }
0x1751   :  { %v1506_v53 = vpop.xlane.xlu0 %1505 }
0x1752   :  { %3628 = vrcp.f32 %v1506_v53 }
0x175c   :  { %v3629_v32 = vpop.eup %3628 }
0x175d   :  { %v1512_v55 = vrot.slane %v3629_v32, %v4078_v23  ;;  %v1516_v57 = vrot.slane %v3629_v32, %v4107_v49 }
0x175f   :  { %v1519_v56 = vmul.f32 %v3625_v43, %v1512_v55  ;;  %v1520_v58 = vmul.f32 %v3627_v44, %v1516_v57 }
0x1761   :  { %1523 = vperm.xlu1 %3564, %v1519_v56  }
0x1765   :  { %1603 = vperm.xlu1 %3564, %v1520_v58  }
0x17e0   :  { %v1524_v40 = vpop.permute.xlu1 %1523 }
0x17e1   :  { %v1528_v59 = vrot.slane %v1524_v40, %v4100_v42  ;;  %v1721_v34 = vrot.slane %v1524_v40, %v4154_v52 }
0x17e3   :  { %3434 = vmatmul.mubr.msk.f32.vlgmr.msra.gmra.mrb[10].mxu0 %vm336_vm4, %v1528_v59 }
0x17e4   :  { %3437 = vmatpush3.msra.mxu0 %v4129_v16  ;;  %v1604_v60 = vpop.permute.xlu1 %1603  ;;  %3438 = vmatprep.mubr.msk.f32.mxu0 %vm3917_vm3, %v3914_v0 }
0x17e5   :  { %v1608_v17 = vrot.slane %v1604_v60, %v4100_v42  ;;  %3441 = vmatprep.subr.mxu0 %v3914_v0  ;;  %v1725_v31 = vrot.slane %v1604_v60, %v4154_v52 }
0x17e7   :  { %3439 = vmatmul.mubr.msk.f32.vlgmr.msra.gmra.mrb[12].mxu0 %vm336_vm4, %v1608_v17  ;;  %v1726_v35 = vsel %vm269_vm1, %v1725_v31, %v1721_v34 }
0x17e8   :  { %3442 = vmatpush3.msra.mxu0 %v4117_v10  ;;  %3443 = vmatprep.mubr.msk.f32.mxu0 %vm3917_vm3, %v3914_v0 }
0x17e9   :  { %3446 = vmatprep.subr.mxu0 %v3914_v0 }
0x18b6   :  { %v1597_v61 = vpop.f32.mrb[10].mxu0 }
0x18b7   :  { %v3435_v63 = vpop.f32.mrb[11].mxu0 }
0x18ba   :  { %v1677_v2 = vpop.f32.mrb[12].mxu0 }
0x18bb   :  { %v1686_v3 = vrot.slane %v1677_v2, 7  ;;  %v3440_v5 = vpop.f32.mrb[13].mxu0 }
0x18bd   :  { %v1687_v7 = vsel %vm269_vm1, %v1686_v3, %v1597_v61 }
0x18be   :  { %v1689_v11 = vadd.f32 %v1687_v7, %v1683_v6 }
0x18c0   :  { %3630 = vtanh.f32 %v1689_v11  ;;  %v3352_v14 = vmul.f32 -1.442695, %v1689_v11 }
0x18c2   :  { %3632 = vpow2.f32 %v3352_v14 }
0x18ca   :  { %v3631_v13 = vpop.eup %3630 }
0x18cb   :  { %1699 = vrot.lane.b32.xlu1 %v3631_v13, %s3918_s6 }
0x18cc   :  { %v3633_v15 = vpop.eup %3632 }
0x18cd   :  { %v1693_v18 = vadd.f32 1.0, %v3633_v15 }
0x18cf   :  { %3634 = vrcp.f32 %v1693_v18 }
0x18d9   :  { %v3635_v21 = vpop.eup %3634 }
0x18da   :  { %v1697_v25 = vmul.f32 %v3635_v21, %v4267_v54 }
0x193d   :  { %v1700_v22 = vpop.permute.xlu1 %1699 }
0x193e   :  { %v1702_v24 = vmul.f32 %v3635_v21, %v1700_v22 }
0x1940   :  { %1704 = vrot.lane.b32.xlu1 %v1702_v24, %s3910_s0 }
0x19b2   :  { %v1705_v62 = vpop.permute.xlu1 %1704 }
0x19b3   :  { %v4325_v27 = vadd.f32 %v1705_v62, %v1697_v25 }
0x19b5   :  { %3636 = vtanh.f32 %v4325_v27 }
0x19bf   :  { %v3637_v28 = vpop.eup %3636 }
0x19c0   :  { %1710 = vrot.lane.b32.xlu1 %v3637_v28, %s3918_s6 }
0x1a32   :  { %v1711_v30 = vpop.permute.xlu1 %1710 }
0x1a33   :  { %v1713_v46 = vmul.f32 %v3635_v21, %v1711_v30 }
0x1a35   :  { %1715 = vrot.lane.b32.xlu1 %v1713_v46, %s3910_s0 }
0x1aa7   :  { %v1716_v36 = vpop.permute.xlu1 %1715 }
0x1aa8   :  { %v1728_v54 = vsel %vm131_vm0, %v1716_v36, %v1726_v35  ;;  %3353 = vmatmul.mubr.msk.f32.vlgmr.msra.gmra.mrb[10].mxu1 %vm131_vm0, %v1716_v36 }
0x1aa9   :  { %v1729_v37 = vsel %vm541_vm5, %v1728_v54, 0.0  ;;  %3524 = vmatpush1.bf16.msra.mxu1 %v4057_v8  ;;  %2194 = vmatprep.mubr.f32.mxu1 %v3914_v0 }
0x1aaa   :  { %1731 = vst [vmem:[#allocation14 + $0x6] sm:$0x3] %v1729_v37  ;;  %3526 = vmatprep.subr.bf16.mxu1 %v4059_v9 }
0x1aad   :  { %3528 = vmatpush1.bf16.msra.mxu1 %v4063_v12 }
0x1aae   :  { %3530 = vmatprep.subr.bf16.mxu1 %v4055_v4 }
0x1b7b   :  { %v4341_v38 = vpop.f32.mrb[10].mxu1 }
0x1b7c   :  { %v1802_v39 = vpop.f32.mrb[11].mxu1 }
0x1b7d   :  { %v1812_v41 = vrot.slane %v1802_v39, %v4072_v19 }
0x1b7f   :  { %v1813_v43 = vcombine.high %v1812_v41, %v1812_v41  ;;  %v1820_v44 = vrot.slane %v1812_v41, %v4072_v19 }
0x1b81   :  { %v1827_v20 = vrot.slane %v1813_v43, %v4072_v19  ;;  %v1831_v45 = vrot.slane %v1820_v44, %v4078_v23 }
0x1b83   :  { %v1835_v47 = vrot.slane %v1827_v20, %v4078_v23  ;;  %v1838_v48 = vadd.f32 %v1831_v45, %v4081_v26 }
0x1b85   :  { %v1839_v50 = vadd.f32 %v1835_v47, %v4085_v29  ;;  %3638 = vtanh.f32 %v1838_v48 }
0x1b87   :  { %3640 = vtanh.f32 %v1839_v50 }
0x1b8f   :  { %v3639_v51 = vpop.eup %3638 }
0x1b90   :  { %v1842_v53 = vmul.f32 %v3639_v51, %v4090_v33 }
0x1b91   :  { %v3641_v32 = vpop.eup %3640 }
0x1b92   :  { %v1844_v55 = vsel %vm131_vm0, %v1842_v53, 0.0  ;;  %v1843_v56 = vmul.f32 %v3641_v32, %v4090_v33 }
0x1b93   :  { %1845 = vadd.xlane.f32.xlu0 %v1844_v55 }
0x1b94   :  { %v1847_v57 = vsel %vm131_vm0, %v1843_v56, 0.0 }
0x1b95   :  { %1848 = vadd.xlane.f32.xlu1 %v1847_v57 }
0x1c20   :  { %v1846_v58 = vpop.xlane.xlu0 %1845 }
0x1c21   :  { %v1855_v26 = vrot.slane %v1846_v58, %v4100_v42 }
0x1c22   :  { %v1849_v40 = vpop.xlane.xlu1 %1848 }
0x1c23   :  { %v1859_v29 = vrot.slane %v1849_v40, %v4100_v42 }
0x1c25   :  { %v1860_v59 = vsel %vm269_vm1, %v1859_v29, %v1855_v26 }
0x1c26   :  { %v1862_v60 = vsel %vm272_vm2, %v1860_v59, -inf }
0x1c27   :  { %1863 = vmax.xlane.f32.xlu0 %v1862_v60 }
0x1cb4   :  { %v1864_v17 = vpop.xlane.xlu0 %1863 }
0x1cb5   :  { %v1869_v61 = vrot.slane %v1864_v17, %v4078_v23  ;;  %v1873_v33 = vrot.slane %v1864_v17, %v4107_v49 }
0x1cb7   :  { %v1876_v63 = vsub.f32 %v1846_v58, %v1869_v61  ;;  %v1877_v1 = vsub.f32 %v1849_v40, %v1873_v33 }
0x1cb9   :  { %v1878_v2 = vmul.f32 1.442695, %v1876_v63  ;;  %v1880_v3 = vmul.f32 1.442695, %v1877_v1 }
0x1cbb   :  { %3642 = vpow2.f32 %v1878_v2 }
0x1cbc   :  { %3644 = vpow2.f32 %v1880_v3 }
0x1cc5   :  { %v3643_v5 = vpop.eup %3642 }
0x1cc6   :  { %1885 = vperm.xlu0 %3565, %v3643_v5   ;;  %v3645_v6 = vpop.eup %3644 }
0x1cca   :  { %1888 = vperm.xlu0 %3565, %v3645_v6  }
0x1d45   :  { %v1886_v7 = vpop.permute.xlu0 %1885 }
0x1d46   :  { %v1893_v13 = vrot.slane %v1886_v7, %v4100_v42  ;;  %v4409_v7 = vld [vmem:[#allocation2 + $0x8] sm:$0xff] }
0x1d49   :  { %v1889_v11 = vpop.permute.xlu0 %1888 }
0x1d4a   :  { %v1897_v14 = vrot.slane %v1889_v11, %v4100_v42 }
0x1d4c   :  { %v1898_v15 = vsel %vm269_vm1, %v1897_v14, %v1893_v13  ;;  %v4412_v13 = vld [vmem:[#allocation13] ss:$0 sm:$0xff] }
0x1d4d   :  { %v1900_v18 = vsel %vm272_vm2, %v1898_v15, 0.0 }
0x1d4e   :  { %1901 = vadd.xlane.f32.xlu0 %v1900_v18 }
0x1ddb   :  { %v1902_v21 = vpop.xlane.xlu0 %1901 }
0x1ddc   :  { %3646 = vrcp.f32 %v1902_v21 }
0x1de6   :  { %v3647_v22 = vpop.eup %3646 }
0x1de7   :  { %v1908_v24 = vrot.slane %v3647_v22, %v4078_v23  ;;  %v1912_v62 = vrot.slane %v3647_v22, %v4107_v49 }
0x1de9   :  { %v1915_v25 = vmul.f32 %v3643_v5, %v1908_v24  ;;  %v1916_v28 = vmul.f32 %v3645_v6, %v1912_v62  ;;  %v4406_v5 = vld [vmem:[#allocation2] sm:$0xff] }
0x1deb   :  { %1919 = vperm.xlu1 %3564, %v1915_v25  }
0x1def   :  { %1999 = vperm.xlu1 %3564, %v1916_v28  }
0x1e6a   :  { %v1920_v30 = vpop.permute.xlu1 %1919 }
0x1e6b   :  { %v1924_v46 = vrot.slane %v1920_v30, %v4100_v42  ;;  %v2117_v40 = vrot.slane %v1920_v30, %v4154_v52 }
0x1e6d   :  { %3444 = vmatmul.mubr.msk.f32.vlgmr.msra.gmra.mrb[14].mxu0 %vm336_vm4, %v1924_v46 }
0x1e6e   :  { %3447 = vmatpush3.msra.mxu0 %v4129_v16  ;;  %v2000_v31 = vpop.permute.xlu1 %1999  ;;  %3448 = vmatprep.mubr.msk.f32.mxu0 %vm3917_vm3, %v3914_v0  ;;  %v2078_v16 = vld [vmem:[#allocation7 + $0x8] sm:$0x3] }
0x1e6f   :  { %v2004_v34 = vrot.slane %v2000_v31, %v4100_v42  ;;  %3451 = vmatprep.subr.mxu0 %v3914_v0  ;;  %v2079_v41 = vadd.f32 %v2078_v16, %v4341_v38  ;;  %v2121_v58 = vrot.slane %v2000_v31, %v4154_v52 }
0x1e71   :  { %3449 = vmatmul.mubr.msk.f32.vlgmr.msra.gmra.mrb[16].mxu0 %vm336_vm4, %v2004_v34  ;;  %v2122_v26 = vsel %vm269_vm1, %v2121_v58, %v2117_v40  ;;  %v4432_v58 = vld [vmem:[#allocation5 + $0x8] sm:$0xff] }
0x1e72   :  { %3452 = vmatpush3.msra.mxu0 %v4117_v10  ;;  %3453 = vmatprep.mubr.msk.f32.mxu0 %vm3917_vm3, %v3914_v0 }
0x1e73   :  { %3456 = vmatprep.subr.mxu0 %v3914_v0 }
0x1f40   :  { %v1993_v35 = vpop.f32.mrb[14].mxu0 }
0x1f41   :  { %v3445_v36 = vpop.f32.mrb[15].mxu0 }
0x1f44   :  { %v2073_v54 = vpop.f32.mrb[16].mxu0 }
0x1f45   :  { %v2082_v37 = vrot.slane %v2073_v54, 7  ;;  %v3450_v39 = vpop.f32.mrb[17].mxu0 }
0x1f47   :  { %v2083_v43 = vsel %vm269_vm1, %v2082_v37, %v1993_v35 }
0x1f48   :  { %v2085_v44 = vadd.f32 %v2083_v43, %v2079_v41 }
0x1f4a   :  { %3648 = vtanh.f32 %v2085_v44  ;;  %v3356_v10 = vmul.f32 -1.442695, %v2085_v44 }
0x1f4c   :  { %3650 = vpow2.f32 %v3356_v10 }
0x1f54   :  { %v3649_v20 = vpop.eup %3648 }
0x1f55   :  { %2095 = vrot.lane.b32.xlu1 %v3649_v20, %s3918_s6 }
0x1f56   :  { %v3651_v45 = vpop.eup %3650 }
0x1f57   :  { %v2089_v47 = vadd.f32 1.0, %v3651_v45 }
0x1f59   :  { %3652 = vrcp.f32 %v2089_v47 }
0x1f63   :  { %v3653_v48 = vpop.eup %3652 }
0x1f64   :  { %v2093_v53 = vmul.f32 %v3653_v48, %v4325_v27 }
0x1fc7   :  { %v2096_v50 = vpop.permute.xlu1 %2095 }
0x1fc8   :  { %v2098_v51 = vmul.f32 %v3653_v48, %v2096_v50 }
0x1fca   :  { %2100 = vrot.lane.b32.xlu1 %v2098_v51, %s3910_s0 }
0x203c   :  { %v2101_v38 = vpop.permute.xlu1 %2100 }
0x203d   :  { %v4383_v32 = vadd.f32 %v2101_v38, %v2093_v53 }
0x203f   :  { %3654 = vtanh.f32 %v4383_v32 }
0x2049   :  { %v3655_v55 = vpop.eup %3654 }
0x204a   :  { %2106 = vrot.lane.b32.xlu0 %v3655_v55, %s3918_s6 }
0x20bc   :  { %v2107_v56 = vpop.permute.xlu0 %2106 }
0x20bd   :  { %v2109_v57 = vmul.f32 %v3653_v48, %v2107_v56 }
0x20bf   :  { %2111 = vrot.lane.b32.xlu1 %v2109_v57, %s3910_s0 }
0x2131   :  { %v2112_v29 = vpop.permute.xlu1 %2111 }
0x2132   :  { %v2124_v27 = vsel %vm131_vm0, %v2112_v29, %v2122_v26  ;;  %3357 = vmatmul.mubr.msk.f32.vlgmr.msra.gmra.mrb[12].mxu1 %vm131_vm0, %v2112_v29  ;;  %v4440_v29 = vld [vmem:[#allocation5] sm:$0xff] }
0x2133   :  { %v2125_v59 = vsel %vm541_vm5, %v2124_v27, 0.0  ;;  %3532 = vmatpush1.bf16.msra.mxu1 %v4057_v8  ;;  %2590 = vmatprep.mubr.f32.mxu1 %v3914_v0 }
0x2134   :  { %2127 = vst [vmem:[#allocation14 + $0x8] sm:$0x3] %v2125_v59  ;;  %3534 = vmatprep.subr.bf16.mxu1 %v4059_v9 }
0x2137   :  { %3536 = vmatpush1.bf16.msra.mxu1 %v4063_v12 }
0x2138   :  { %3538 = vmatprep.subr.bf16.mxu1 %v4055_v4 }
0x2205   :  { %v4399_v60 = vpop.f32.mrb[12].mxu1 }
0x2206   :  { %v2198_v17 = vpop.f32.mrb[13].mxu1 }
0x2207   :  { %v2208_v61 = vrot.slane %v2198_v17, %v4072_v19  ;;  %v2474_v17 = vld [vmem:[#allocation7 + $0xa] sm:$0x3] }
0x2209   :  { %v2209_v33 = vcombine.high %v2208_v61, %v2208_v61  ;;  %v2216_v63 = vrot.slane %v2208_v61, %v4072_v19 }
0x220b   :  { %v2223_v1 = vrot.slane %v2209_v33, %v4072_v19  ;;  %v2227_v2 = vrot.slane %v2216_v63, %v4078_v23 }
0x220d   :  { %v2231_v3 = vrot.slane %v2223_v1, %v4078_v23  ;;  %v2234_v6 = vadd.f32 %v4406_v5, %v2227_v2  ;;  %v2475_v1 = vadd.f32 %v2474_v17, %v4399_v60 }
0x220f   :  { %v2235_v4 = vadd.f32 %v4409_v7, %v2231_v3  ;;  %3656 = vtanh.f32 %v2234_v6 }
0x2211   :  { %3658 = vtanh.f32 %v2235_v4 }
0x2219   :  { %v3657_v11 = vpop.eup %3656 }
0x221a   :  { %v2238_v14 = vmul.f32 %v4412_v13, %v3657_v11 }
0x221b   :  { %v3659_v15 = vpop.eup %3658 }
0x221c   :  { %v2240_v18 = vsel %vm131_vm0, %v2238_v14, 0.0  ;;  %v2239_v21 = vmul.f32 %v4412_v13, %v3659_v15 }
0x221d   :  { %2241 = vadd.xlane.f32.xlu1 %v2240_v18 }
0x221e   :  { %v2243_v22 = vsel %vm131_vm0, %v2239_v21, 0.0 }
0x221f   :  { %2244 = vadd.xlane.f32.xlu0 %v2243_v22 }
0x22aa   :  { %v2242_v24 = vpop.xlane.xlu1 %2241 }
0x22ab   :  { %v2251_v62 = vrot.slane %v2242_v24, %v4100_v42 }
0x22ac   :  { %v2245_v25 = vpop.xlane.xlu0 %2244 }
0x22ad   :  { %v2255_v28 = vrot.slane %v2245_v25, %v4100_v42 }
0x22af   :  { %v2256_v30 = vsel %vm269_vm1, %v2255_v28, %v2251_v62 }
0x22b0   :  { %v2258_v46 = vsel %vm272_vm2, %v2256_v30, -inf }
0x22b1   :  { %2259 = vmax.xlane.f32.xlu1 %v2258_v46 }
0x233e   :  { %v2260_v31 = vpop.xlane.xlu1 %2259 }
0x233f   :  { %v2265_v34 = vrot.slane %v2260_v31, %v4078_v23  ;;  %v2269_v35 = vrot.slane %v2260_v31, %v4107_v49 }
0x2341   :  { %v2272_v36 = vsub.f32 %v2242_v24, %v2265_v34  ;;  %v2273_v16 = vsub.f32 %v2245_v25, %v2269_v35 }
0x2343   :  { %v2274_v54 = vmul.f32 1.442695, %v2272_v36  ;;  %v2276_v37 = vmul.f32 1.442695, %v2273_v16 }
0x2345   :  { %3660 = vpow2.f32 %v2274_v54 }
0x2346   :  { %3662 = vpow2.f32 %v2276_v37 }
0x234f   :  { %v3661_v39 = vpop.eup %3660 }
0x2350   :  { %v3663_v41 = vpop.eup %3662  ;;  %2281 = vperm.xlu1 %3564, %v3661_v39  }
0x2351   :  { %2284 = vperm.xlu0 %3565, %v3663_v41  }
0x23cf   :  { %v2282_v43 = vpop.permute.xlu1 %2281 }
0x23d0   :  { %v2285_v44 = vpop.permute.xlu0 %2284  ;;  %v2289_v20 = vrot.slane %v2282_v43, %v4100_v42 }
0x23d1   :  { %v2293_v10 = vrot.slane %v2285_v44, %v4100_v42 }
0x23d3   :  { %v2294_v45 = vsel %vm269_vm1, %v2293_v10, %v2289_v20 }
0x23d4   :  { %v2296_v47 = vsel %vm272_vm2, %v2294_v45, 0.0 }
0x23d5   :  { %2297 = vadd.xlane.f32.xlu1 %v2296_v47 }
0x2462   :  { %v2298_v48 = vpop.xlane.xlu1 %2297 }
0x2463   :  { %3664 = vrcp.f32 %v2298_v48 }
0x246d   :  { %v3665_v50 = vpop.eup %3664 }
0x246e   :  { %v2304_v51 = vrot.slane %v3665_v50, %v4078_v23  ;;  %v2308_v38 = vrot.slane %v3665_v50, %v4107_v49 }
0x2470   :  { %v2311_v53 = vmul.f32 %v3661_v39, %v2304_v51  ;;  %v2312_v55 = vmul.f32 %v3663_v41, %v2308_v38 }
0x2472   :  { %2315 = vperm.xlu0 %3565, %v2311_v53  }
0x2476   :  { %2395 = vperm.xlu0 %3565, %v2312_v55  }
0x24f1   :  { %v2316_v56 = vpop.permute.xlu0 %2315 }
0x24f2   :  { %v2320_v57 = vrot.slane %v2316_v56, %v4100_v42  ;;  %v2513_v46 = vrot.slane %v2316_v56, %v4154_v52 }
0x24f4   :  { %3454 = vmatmul.mubr.msk.f32.vlgmr.msra.gmra.mrb[18].mxu0 %vm336_vm4, %v2320_v57 }
0x24f5   :  { %3457 = vmatpush3.msra.mxu0 %v4432_v58  ;;  %v2396_v40 = vpop.permute.xlu0 %2395  ;;  %3458 = vmatprep.mubr.msk.f32.mxu0 %vm3917_vm3, %v3914_v0 }
0x24f6   :  { %v2400_v26 = vrot.slane %v2396_v40, %v4100_v42  ;;  %3461 = vmatprep.subr.mxu0 %v3914_v0  ;;  %v2517_v30 = vrot.slane %v2396_v40, %v4154_v52 }
0x24f8   :  { %3459 = vmatmul.mubr.msk.f32.vlgmr.msra.gmra.mrb[20].mxu0 %vm336_vm4, %v2400_v26  ;;  %v2518_v31 = vsel %vm269_vm1, %v2517_v30, %v2513_v46 }
0x24f9   :  { %3462 = vmatpush3.msra.mxu0 %v4440_v29  ;;  %3463 = vmatprep.mubr.msk.f32.mxu0 %vm3917_vm3, %v3914_v0 }
0x24fa   :  { %3466 = vmatprep.subr.mxu0 %v3914_v0 }
0x25c7   :  { %v2389_v27 = vpop.f32.mrb[18].mxu0 }
0x25c8   :  { %v3455_v59 = vpop.f32.mrb[19].mxu0 }
0x25cb   :  { %v2469_v61 = vpop.f32.mrb[20].mxu0 }
0x25cc   :  { %v2478_v33 = vrot.slane %v2469_v61, 7  ;;  %v3460_v63 = vpop.f32.mrb[21].mxu0 }
0x25ce   :  { %v2479_v2 = vsel %vm269_vm1, %v2478_v33, %v2389_v27 }
0x25cf   :  { %v2481_v3 = vadd.f32 %v2479_v2, %v2475_v1 }
0x25d1   :  { %3666 = vtanh.f32 %v2481_v3  ;;  %v3360_v4 = vmul.f32 -1.442695, %v2481_v3 }
0x25d3   :  { %3668 = vpow2.f32 %v3360_v4 }
0x25db   :  { %v3667_v6 = vpop.eup %3666 }
0x25dc   :  { %2491 = vrot.lane.b32.xlu0 %v3667_v6, %s3918_s6 }
0x25dd   :  { %v3669_v11 = vpop.eup %3668 }
0x25de   :  { %v2485_v14 = vadd.f32 1.0, %v3669_v11 }
0x25e0   :  { %3670 = vrcp.f32 %v2485_v14 }
0x25ea   :  { %v3671_v15 = vpop.eup %3670 }
0x25eb   :  { %v2489_v22 = vmul.f32 %v3671_v15, %v4383_v32 }
0x264e   :  { %v2492_v18 = vpop.permute.xlu0 %2491 }
0x264f   :  { %v2494_v21 = vmul.f32 %v3671_v15, %v2492_v18 }
0x2651   :  { %2496 = vrot.lane.b32.xlu0 %v2494_v21, %s3910_s0 }
0x26c3   :  { %v2497_v60 = vpop.permute.xlu0 %2496 }
0x26c4   :  { %v4451_v24 = vadd.f32 %v2497_v60, %v2489_v22 }
0x26c6   :  { %3672 = vtanh.f32 %v4451_v24 }
0x26d0   :  { %v3673_v25 = vpop.eup %3672 }
0x26d1   :  { %2502 = vrot.lane.b32.xlu0 %v3673_v25, %s3918_s6 }
0x2743   :  { %v2503_v62 = vpop.permute.xlu0 %2502 }
0x2744   :  { %v2505_v28 = vmul.f32 %v3671_v15, %v2503_v62 }
0x2746   :  { %2507 = vrot.lane.b32.xlu0 %v2505_v28, %s3910_s0 }
0x27b8   :  { %v2508_v34 = vpop.permute.xlu0 %2507 }
0x27b9   :  { %v2520_v32 = vsel %vm131_vm0, %v2508_v34, %v2518_v31  ;;  %3361 = vmatmul.mubr.msk.f32.vlgmr.msra.gmra.mrb[14].mxu1 %vm131_vm0, %v2508_v34  ;;  %v2870_v34 = vld [vmem:[#allocation7 + $0xc] sm:$0x3] }
0x27ba   :  { %v2521_v35 = vsel %vm541_vm5, %v2520_v32, 0.0  ;;  %3540 = vmatpush1.bf16.msra.mxu1 %v4057_v8  ;;  %2986 = vmatprep.mubr.f32.mxu1 %v3914_v0 }
0x27bb   :  { %2523 = vst [vmem:[#allocation14 + $0xa] sm:$0x3] %v2521_v35  ;;  %3542 = vmatprep.subr.bf16.mxu1 %v4059_v9 }
0x27be   :  { %3544 = vmatpush1.bf16.msra.mxu1 %v4063_v12 }
0x288c   :  { %v4466_v36 = vpop.f32.mrb[14].mxu1 }
0x288d   :  { %v2594_v16 = vpop.f32.mrb[15].mxu1 }
0x288e   :  { %v2604_v54 = vrot.slane %v2594_v16, %v4072_v19 }
0x2890   :  { %v2605_v37 = vcombine.high %v2604_v54, %v2604_v54  ;;  %v2612_v39 = vrot.slane %v2604_v54, %v4072_v19  ;;  %v2871_v54 = vadd.f32 %v2870_v34, %v4466_v36 }
0x2892   :  { %v2619_v41 = vrot.slane %v2605_v37, %v4072_v19  ;;  %v2623_v43 = vrot.slane %v2612_v39, %v4078_v23 }
0x2894   :  { %v2627_v8 = vrot.slane %v2619_v41, %v4078_v23  ;;  %v2630_v44 = vadd.f32 %v4406_v5, %v2623_v43 }
0x2896   :  { %v2631_v9 = vadd.f32 %v4409_v7, %v2627_v8  ;;  %3674 = vtanh.f32 %v2630_v44 }
0x2898   :  { %3676 = vtanh.f32 %v2631_v9 }
0x28a0   :  { %v3675_v12 = vpop.eup %3674 }
0x28a1   :  { %v2634_v20 = vmul.f32 %v4412_v13, %v3675_v12 }
0x28a2   :  { %v3677_v10 = vpop.eup %3676 }
0x28a3   :  { %v2636_v45 = vsel %vm131_vm0, %v2634_v20, 0.0  ;;  %v2635_v47 = vmul.f32 %v4412_v13, %v3677_v10 }
0x28a4   :  { %2637 = vadd.xlane.f32.xlu1 %v2636_v45 }
0x28a5   :  { %v2639_v48 = vsel %vm131_vm0, %v2635_v47, 0.0 }
0x28a6   :  { %2640 = vadd.xlane.f32.xlu0 %v2639_v48 }
0x2931   :  { %v2638_v50 = vpop.xlane.xlu1 %2637 }
0x2932   :  { %v2647_v53 = vrot.slane %v2638_v50, %v4100_v42 }
0x2933   :  { %v2641_v51 = vpop.xlane.xlu0 %2640 }
0x2934   :  { %v2651_v38 = vrot.slane %v2641_v51, %v4100_v42 }
0x2936   :  { %v2652_v55 = vsel %vm269_vm1, %v2651_v38, %v2647_v53 }
0x2937   :  { %v2654_v56 = vsel %vm272_vm2, %v2652_v55, -inf }
0x2938   :  { %2655 = vmax.xlane.f32.xlu1 %v2654_v56 }
0x29c5   :  { %v2656_v57 = vpop.xlane.xlu1 %2655 }
0x29c6   :  { %v2661_v40 = vrot.slane %v2656_v57, %v4078_v23  ;;  %v2665_v26 = vrot.slane %v2656_v57, %v4107_v49 }
0x29c8   :  { %v2668_v27 = vsub.f32 %v2638_v50, %v2661_v40  ;;  %v2669_v59 = vsub.f32 %v2641_v51, %v2665_v26 }
0x29ca   :  { %v2670_v17 = vmul.f32 1.442695, %v2668_v27  ;;  %v2672_v61 = vmul.f32 1.442695, %v2669_v59 }
0x29cc   :  { %3678 = vpow2.f32 %v2670_v17 }
0x29cd   :  { %3680 = vpow2.f32 %v2672_v61 }
0x29d6   :  { %v3679_v33 = vpop.eup %3678 }
0x29d7   :  { %2677 = vperm.xlu1 %3564, %v3679_v33   ;;  %v3681_v63 = vpop.eup %3680 }
0x29db   :  { %2680 = vperm.xlu1 %3564, %v3681_v63  }
0x2a56   :  { %v2678_v1 = vpop.permute.xlu1 %2677 }
0x2a57   :  { %v2685_v3 = vrot.slane %v2678_v1, %v4100_v42 }
0x2a5a   :  { %v2681_v2 = vpop.permute.xlu1 %2680 }
0x2a5b   :  { %v2689_v6 = vrot.slane %v2681_v2, %v4100_v42 }
0x2a5d   :  { %v2690_v4 = vsel %vm269_vm1, %v2689_v6, %v2685_v3 }
0x2a5e   :  { %v2692_v11 = vsel %vm272_vm2, %v2690_v4, 0.0 }
0x2a5f   :  { %2693 = vadd.xlane.f32.xlu1 %v2692_v11 }
0x2aec   :  { %v2694_v14 = vpop.xlane.xlu1 %2693 }
0x2aed   :  { %3682 = vrcp.f32 %v2694_v14 }
0x2af7   :  { %v3683_v15 = vpop.eup %3682 }
0x2af8   :  { %v2700_v18 = vrot.slane %v3683_v15, %v4078_v23  ;;  %v2704_v22 = vrot.slane %v3683_v15, %v4107_v49 }
0x2afa   :  { %v2707_v21 = vmul.f32 %v3679_v33, %v2700_v18  ;;  %v2708_v60 = vmul.f32 %v3681_v63, %v2704_v22 }
0x2afc   :  { %2711 = vperm.xlu0 %3565, %v2707_v21  }
0x2b00   :  { %2791 = vperm.xlu0 %3565, %v2708_v60  }
0x2b7b   :  { %v2712_v25 = vpop.permute.xlu0 %2711 }
0x2b7c   :  { %v2716_v62 = vrot.slane %v2712_v25, %v4100_v42  ;;  %v2909_v51 = vrot.slane %v2712_v25, %v4154_v52 }
0x2b7e   :  { %3464 = vmatmul.mubr.msk.f32.vlgmr.msra.gmra.mrb[22].mxu0 %vm336_vm4, %v2716_v62 }
0x2b7f   :  { %3467 = vmatpush3.msra.mxu0 %v4432_v58  ;;  %v2792_v28 = vpop.permute.xlu0 %2791  ;;  %3468 = vmatprep.mubr.msk.f32.mxu0 %vm3917_vm3, %v3914_v0 }
0x2b80   :  { %v2796_v30 = vrot.slane %v2792_v28, %v4100_v42  ;;  %3471 = vmatprep.subr.mxu0 %v3914_v0  ;;  %v2913_v50 = vrot.slane %v2792_v28, %v4154_v52 }
0x2b82   :  { %3469 = vmatmul.mubr.msk.f32.vlgmr.msra.gmra.mrb[24].mxu0 %vm336_vm4, %v2796_v30  ;;  %v2914_v53 = vsel %vm269_vm1, %v2913_v50, %v2909_v51 }
0x2b83   :  { %3472 = vmatpush3.msra.mxu0 %v4440_v29  ;;  %3473 = vmatprep.mubr.msk.f32.mxu0 %vm3917_vm3, %v3914_v0 }
0x2b84   :  { %3476 = vmatprep.subr.mxu0 %v3914_v0 }
0x2c51   :  { %v2785_v46 = vpop.f32.mrb[22].mxu0 }
0x2c52   :  { %v3465_v31 = vpop.f32.mrb[23].mxu0 }
0x2c55   :  { %v2865_v32 = vpop.f32.mrb[24].mxu0 }
0x2c56   :  { %v2874_v35 = vrot.slane %v2865_v32, 7  ;;  %v3470_v16 = vpop.f32.mrb[25].mxu0 }
0x2c58   :  { %v2875_v37 = vsel %vm269_vm1, %v2874_v35, %v2785_v46 }
0x2c59   :  { %v2877_v39 = vadd.f32 %v2875_v37, %v2871_v54 }
0x2c5b   :  { %3684 = vtanh.f32 %v2877_v39  ;;  %v3364_v29 = vmul.f32 -1.442695, %v2877_v39 }
0x2c5d   :  { %3686 = vpow2.f32 %v3364_v29 }
0x2c65   :  { %v3685_v41 = vpop.eup %3684 }
0x2c66   :  { %2887 = vrot.lane.b32.xlu0 %v3685_v41, %s3918_s6 }
0x2c67   :  { %v3687_v43 = vpop.eup %3686 }
0x2c68   :  { %v2881_v8 = vadd.f32 1.0, %v3687_v43 }
0x2c6a   :  { %3688 = vrcp.f32 %v2881_v8 }
0x2c74   :  { %v3689_v44 = vpop.eup %3688 }
0x2c75   :  { %v2885_v20 = vmul.f32 %v3689_v44, %v4451_v24 }
0x2cd8   :  { %v2888_v9 = vpop.permute.xlu0 %2887 }
0x2cd9   :  { %v2890_v12 = vmul.f32 %v3689_v44, %v2888_v9 }
0x2cdb   :  { %2892 = vrot.lane.b32.xlu0 %v2890_v12, %s3910_s0 }
0x2d4d   :  { %v2893_v36 = vpop.permute.xlu0 %2892 }
0x2d4e   :  { %v4508_v10 = vadd.f32 %v2893_v36, %v2885_v20  ;;  %v3266_v36 = vld [vmem:[#allocation7 + $0xe] sm:$0x3] }
0x2d50   :  { %3690 = vtanh.f32 %v4508_v10 }
0x2d5a   :  { %v3691_v45 = vpop.eup %3690 }
0x2d5b   :  { %2898 = vrot.lane.b32.xlu1 %v3691_v45, %s3918_s6 }
0x2dcd   :  { %v2899_v47 = vpop.permute.xlu1 %2898 }
0x2dce   :  { %v2901_v48 = vmul.f32 %v3689_v44, %v2899_v47 }
0x2dd0   :  { %2903 = vrot.lane.b32.xlu0 %v2901_v48, %s3910_s0 }
0x2e42   :  { %v2904_v38 = vpop.permute.xlu0 %2903 }
0x2e43   :  { %v2916_v24 = vsel %vm131_vm0, %v2904_v38, %v2914_v53  ;;  %3365 = vmatmul.mubr.msk.f32.vlgmr.msra.gmra.mrb[16].mxu1 %vm131_vm0, %v2904_v38 }
0x2e44   :  { %v2917_v55 = vsel %vm541_vm5, %v2916_v24, 0.0 }
0x2e45   :  { %2919 = vst [vmem:[#allocation14 + $0xc] sm:$0x3] %v2917_v55 }
0x2f16   :  { %v4519_v56 = vpop.f32.mrb[16].mxu1 }
0x2f17   :  { %v2990_v57 = vpop.f32.mrb[17].mxu1  ;;  %v3267_v50 = vadd.f32 %v3266_v36, %v4519_v56 }
0x2f18   :  { %v3000_v40 = vrot.slane %v2990_v57, %v4072_v19 }
0x2f1a   :  { %v3001_v26 = vcombine.high %v3000_v40, %v3000_v40  ;;  %v3008_v27 = vrot.slane %v3000_v40, %v4072_v19 }
0x2f1c   :  { %v3015_v59 = vrot.slane %v3001_v26, %v4072_v19  ;;  %v3019_v17 = vrot.slane %v3008_v27, %v4078_v23 }
0x2f1e   :  { %v3023_v61 = vrot.slane %v3015_v59, %v4078_v23  ;;  %v3026_v33 = vadd.f32 %v4406_v5, %v3019_v17 }
0x2f20   :  { %v3027_v63 = vadd.f32 %v4409_v7, %v3023_v61  ;;  %3692 = vtanh.f32 %v3026_v33 }
0x2f22   :  { %3694 = vtanh.f32 %v3027_v63 }
0x2f2a   :  { %v3693_v1 = vpop.eup %3692 }
0x2f2b   :  { %v3030_v2 = vmul.f32 %v4412_v13, %v3693_v1 }
0x2f2c   :  { %v3695_v3 = vpop.eup %3694 }
0x2f2d   :  { %v3032_v6 = vsel %vm131_vm0, %v3030_v2, 0.0  ;;  %v3031_v4 = vmul.f32 %v4412_v13, %v3695_v3 }
0x2f2e   :  { %3033 = vadd.xlane.f32.xlu0 %v3032_v6 }
0x2f2f   :  { %v3035_v19 = vsel %vm131_vm0, %v3031_v4, 0.0 }
0x2f30   :  { %3036 = vadd.xlane.f32.xlu1 %v3035_v19 }
0x2fbb   :  { %v3034_v11 = vpop.xlane.xlu0 %3033 }
0x2fbc   :  { %v3043_v5 = vrot.slane %v3034_v11, %v4100_v42 }
0x2fbd   :  { %v3037_v14 = vpop.xlane.xlu1 %3036 }
0x2fbe   :  { %v3047_v7 = vrot.slane %v3037_v14, %v4100_v42 }
0x2fc0   :  { %v3048_v15 = vsel %vm269_vm1, %v3047_v7, %v3043_v5 }
0x2fc1   :  { %v3050_v18 = vsel %vm272_vm2, %v3048_v15, -inf }
0x2fc2   :  { %3051 = vmax.xlane.f32.xlu0 %v3050_v18 }
0x304f   :  { %v3052_v21 = vpop.xlane.xlu0 %3051 }
0x3050   :  { %v3057_v22 = vrot.slane %v3052_v21, %v4078_v23  ;;  %v3061_v13 = vrot.slane %v3052_v21, %v4107_v49 }
0x3052   :  { %v3064_v60 = vsub.f32 %v3034_v11, %v3057_v22  ;;  %v3065_v25 = vsub.f32 %v3037_v14, %v3061_v13 }
0x3054   :  { %v3066_v62 = vmul.f32 1.442695, %v3064_v60  ;;  %v3068_v28 = vmul.f32 1.442695, %v3065_v25 }
0x3056   :  { %3696 = vpow2.f32 %v3066_v62 }
0x3057   :  { %3698 = vpow2.f32 %v3068_v28 }
0x3060   :  { %v3697_v30 = vpop.eup %3696 }
0x3061   :  { %v3699_v46 = vpop.eup %3698  ;;  %3073 = vperm.xlu0 %3565, %v3697_v30  }
0x3062   :  { %3076 = vperm.xlu1 %3564, %v3699_v46  }
0x30e0   :  { %v3074_v31 = vpop.permute.xlu0 %3073 }
0x30e1   :  { %v3077_v34 = vpop.permute.xlu1 %3076  ;;  %v3081_v32 = vrot.slane %v3074_v31, %v4100_v42 }
0x30e2   :  { %v3085_v35 = vrot.slane %v3077_v34, %v4100_v42 }
0x30e4   :  { %v3086_v16 = vsel %vm269_vm1, %v3085_v35, %v3081_v32 }
0x30e5   :  { %v3088_v54 = vsel %vm272_vm2, %v3086_v16, 0.0 }
0x30e6   :  { %3089 = vadd.xlane.f32.xlu0 %v3088_v54 }
0x3173   :  { %v3090_v37 = vpop.xlane.xlu0 %3089 }
0x3174   :  { %3700 = vrcp.f32 %v3090_v37 }
0x317e   :  { %v3701_v39 = vpop.eup %3700 }
0x317f   :  { %v3096_v41 = vrot.slane %v3701_v39, %v4078_v23  ;;  %v3100_v43 = vrot.slane %v3701_v39, %v4107_v49 }
0x3181   :  { %v3103_v29 = vmul.f32 %v3697_v30, %v3096_v41  ;;  %v3104_v8 = vmul.f32 %v3699_v46, %v3100_v43 }
0x3183   :  { %3107 = vperm.xlu1 %3564, %v3103_v29  }
0x3187   :  { %3187 = vperm.xlu1 %3564, %v3104_v8  }
0x3202   :  { %v3108_v44 = vpop.permute.xlu1 %3107 }
0x3203   :  { %v3112_v9 = vrot.slane %v3108_v44, %v4100_v42  ;;  %v3305_v33 = vrot.slane %v3108_v44, %v4154_v52 }
0x3205   :  { %3474 = vmatmul.mubr.msk.f32.vlgmr.msra.gmra.mrb[26].mxu0 %vm336_vm4, %v3112_v9 }
0x3206   :  { %3477 = vmatpush3.msra.mxu0 %v4432_v58  ;;  %v3188_v12 = vpop.permute.xlu1 %3187  ;;  %3478 = vmatprep.mubr.msk.f32.mxu0 %vm3917_vm3, %v3914_v0 }
0x3207   :  { %v3192_v20 = vrot.slane %v3188_v12, %v4100_v42  ;;  %v3309_v61 = vrot.slane %v3188_v12, %v4154_v52 }
0x3209   :  { %3479 = vmatmul.mubr.msk.f32.vlgmr.msra.gmra.mrb[28].mxu0 %vm336_vm4, %v3192_v20  ;;  %v3310_v63 = vsel %vm269_vm1, %v3309_v61, %v3305_v33 }
0x32d8   :  { %v3181_v23 = vpop.f32.mrb[26].mxu0 }
0x32d9   :  { %v3475_v49 = vpop.f32.mrb[27].mxu0 }
0x32dc   :  { %v3261_v45 = vpop.f32.mrb[28].mxu0 }
0x32dd   :  { %v3270_v47 = vrot.slane %v3261_v45, 7  ;;  %v3480_v48 = vpop.f32.mrb[29].mxu0 }
0x32df   :  { %v3271_v51 = vsel %vm269_vm1, %v3270_v47, %v3181_v23 }
0x32e0   :  { %v3273_v53 = vadd.f32 %v3271_v51, %v3267_v50 }
0x32e2   :  { %3702 = vtanh.f32 %v3273_v53  ;;  %v3368_v0 = vmul.f32 -1.442695, %v3273_v53 }
0x32e4   :  { %3704 = vpow2.f32 %v3368_v0 }
0x32ec   :  { %v3703_v58 = vpop.eup %3702 }
0x32ed   :  { %3283 = vrot.lane.b32.xlu1 %v3703_v58, %s3918_s6 }
0x32ee   :  { %v3705_v42 = vpop.eup %3704 }
0x32ef   :  { %v3277_v38 = vadd.f32 1.0, %v3705_v42 }
0x32f1   :  { %3706 = vrcp.f32 %v3277_v38 }
0x32fb   :  { %v3707_v24 = vpop.eup %3706 }
0x32fc   :  { %v3281_v40 = vmul.f32 %v3707_v24, %v4508_v10 }
0x335f   :  { %v3284_v55 = vpop.permute.xlu1 %3283 }
0x3360   :  { %v3286_v57 = vmul.f32 %v3707_v24, %v3284_v55 }
0x3362   :  { %3288 = vrot.lane.b32.xlu1 %v3286_v57, %s3910_s0 }
0x33d4   :  { %v3289_v56 = vpop.permute.xlu1 %3288 }
0x33d5   :  { %v3291_v26 = vadd.f32 %v3289_v56, %v3281_v40 }
0x33d7   :  { %3708 = vtanh.f32 %v3291_v26 }
0x33e1   :  { %v3709_v27 = vpop.eup %3708 }
0x33e2   :  { %3294 = vrot.lane.b32.xlu1 %v3709_v27, %s3918_s6 }
0x3454   :  { %v3295_v59 = vpop.permute.xlu1 %3294 }
0x3455   :  { %v3297_v17 = vmul.f32 %v3707_v24, %v3295_v59 }
0x3457   :  { %3299 = vrot.lane.b32.xlu1 %v3297_v17, %s3910_s0 }
0x34c9   :  { %v3300_v1 = vpop.permute.xlu1 %3299 }
0x34ca   :  { %v3312_v10 = vsel %vm131_vm0, %v3300_v1, %v3310_v63 }
0x34cb   :  { %v3313_v2 = vsel %vm541_vm5, %v3312_v10, 0.0 }
0x34cc   :  { %3315 = vst [vmem:[#allocation14 + $0xe] sm:$0x3] %v3313_v2 }
0x34cd   :  { %3880 = shalt.err (!%p3877_p4)
}
0x34ce   :  { %s3881_s20 = scalar_lea.hbm %s4585_s7, 256 }
0x34cf   :  { %p3882_p5 = scmp.ne.s32.totalorder %s4585_s7, %s3881_s20  ;;  %p3885_p6 = scmp.lt.u32.totalorder %s3881_s20, %s4585_s7 }
0x34d1   :  { %p3887_p7 = pnand %p3885_p6, %p3882_p5 }
0x34d3   :  { %3890 = shalt.err (!%p3887_p7)
}
0x34d4   :  { %3327 = dma.vmem_to_hbm [thread:$0]  %s3322_s16, 256, %s4585_s7, [#allocation4], %s3910_s0, %s3910_s0, %s3911_s13  }
0x34d5   :  { %3899 = dma.done.wait [#allocation4], 256  }
0x34d6   :  { %3900 = vsyncadd [#allocation4], 4294967040 }
0x34d7   :  { %3331 = vsyncpa [#allocation3], 1 }
0x34d8   :  { %3332 = vsyncpa [#allocation6], 1 }
0x34d9   :  { %3333 = vsyncpa [#allocation9], 1 }
0x34da   :  { %3334 = vsyncpa [#allocation12], 1 }
0x34db   :  { %3335 = vsyncpa [#allocation4], 1 }

</bundles_post_ra>
